<compile_context>
chip_gen: v7x
topology: tpu7x:2x2x1
jax: 0.10.0
libtpu: 0.0.40
codegen_flags: <defaults>
</compile_context>

<pallas_src>
import functools

import jax
import jax.numpy as jnp
import numpy as np
from jax import lax
from jax.experimental import pallas as pl
from jax.experimental.pallas import tpu as pltpu

INPUT_SIZE = 26
IN_PAD = 128              # lane-aligned input feature width
HIDDEN = 64
HIDDEN_PAD = 128          # lane-aligned gate slot width
OUT_DIM = 2
OUT_PAD = 128             # lane-dense output slab
BATCH_PAD = 8             # one sublane tile


def lstm_kernel(x_ref, w_ih_ref, w_hh_ref, b_ref, w_out_ref, b_out_ref,
                out_ref, gx_ref, *, T, BP):
    HP = HIDDEN_PAD
    mxu_dtype = w_hh_ref.dtype   # bf16 (perf default) or f32 (validation path)

    # --- Hoisted input projection: one MXU matmul over all T*BP rows, off the
    #     serial recurrence path.  f32 accumulation; result parked in VMEM
    #     scratch so it does not pin vregs across the unrolled time loop. ---
    gx = (jnp.dot(x_ref[...], w_ih_ref[...],
                  preferred_element_type=jnp.float32)
          + b_ref[...])                                      # (T*BP, 4*HP) f32
    for t in range(T):                                       # sublane-aligned slabs
        gx_ref[t] = gx[t * BP:(t + 1) * BP, :]

    def sigmoid(z):
        # Single EUP tanh + VPU fma; avoids exp + true-divide on the serial path.
        return 0.5 * jnp.tanh(0.5 * z) + 0.5

    # h / c carried as loop values (vregs), all-f32; padded columns stay exactly 0.
    h = jnp.zeros((BP, HP), jnp.float32)
    c = jnp.zeros((BP, HP), jnp.float32)

    # TODO(synk): hold w_hh in the MXU across the loop via pltpu.matmul_push_rhs /
    # matmul_acc_lhs / matmul_pop once the pop/reset semantics are validated per
    # generation; for now the bf16 RHS (128 KB) is re-streamed each step, which
    # the vld slots largely hide behind the dependent matmul chain.
    for t in range(T):                                       # T static -> fully unrolled
        gates = (gx_ref[t]                                   # (BP, 4*HP) f32, aligned tile
                 + jnp.dot(h.astype(mxu_dtype), w_hh_ref[...],
                           preferred_element_type=jnp.float32))
        # Lane-aligned 128-wide gate slices (PyTorch order i, f, g, o).
        i_g = sigmoid(gates[:, 0 * HP:1 * HP])
        f_g = sigmoid(gates[:, 1 * HP:2 * HP])
        g_g = jnp.tanh(gates[:, 2 * HP:3 * HP])
        o_g = sigmoid(gates[:, 3 * HP:4 * HP])
        c = f_g * c + i_g * g_g
        h = o_g * jnp.tanh(c)

    # Final Linear head, kept in f32 (one-shot, off the critical path).  Padded
    # h columns / w_out rows are zero, so no slicing is needed.  Lane-dense
    # (BP, 128) result -> unmasked stores.
    out_ref[...] = (jnp.dot(h, w_out_ref[...],
                            preferred_element_type=jnp.float32)
                    + b_out_ref[...])


def pack_params(w_ih, w_hh, b_ih, b_hh, w_out, b_out, mxu_dtype=jnp.bfloat16):
    """Weight-constant packing — call ONCE per model, not per forward."""
    H, HP, I, IP = HIDDEN, HIDDEN_PAD, INPUT_SIZE, IN_PAD

    def pack_gate_cols(w_t):
        # (rows, 4H) -> (rows, 4*HP): each gate's H columns at a 128-lane slot.
        rows = w_t.shape[0]
        out = jnp.zeros((rows, 4 * HP), jnp.float32)
        for k in range(4):
            out = out.at[:, k * HP:k * HP + H].set(w_t[:, k * H:(k + 1) * H])
        return out

    w_ih_p = (jnp.zeros((IP, 4 * HP), jnp.float32)
              .at[:I, :].set(pack_gate_cols(w_ih.T.astype(jnp.float32)))
              .astype(mxu_dtype))                                    # (IP, 4*HP)
    w_hh_p = (jnp.zeros((HP, 4 * HP), jnp.float32)
              .at[:H, :].set(pack_gate_cols(w_hh.T.astype(jnp.float32)))
              .astype(mxu_dtype))                                    # (HP, 4*HP)
    b_p = pack_gate_cols((b_ih + b_hh).reshape(1, 4 * H)
                         .astype(jnp.float32))                       # (1, 4*HP) f32
    w_out_p = (jnp.zeros((HP, OUT_PAD), jnp.float32)
               .at[:H, :OUT_DIM].set(w_out.T.astype(jnp.float32)))   # (HP, OUT_PAD) f32
    b_out_p = (jnp.zeros((1, OUT_PAD), jnp.float32)
               .at[0, :OUT_DIM].set(b_out.astype(jnp.float32)))      # (1, OUT_PAD) f32
    return (w_ih_p, w_hh_p, b_p, w_out_p, b_out_p)


def rnn_forward(x, packed):
    """x: (B, T, INPUT_SIZE) f32.  packed: output of pack_params (weight-constant)."""
    w_ih_p, w_hh_p, b_p, w_out_p, b_out_p = packed
    B, T, I = x.shape
    BP = BATCH_PAD
    mxu_dtype = w_ih_p.dtype

    # Cheap per-call glue only: pad batch to one sublane tile and features to one
    # lane tile, go time-major so step t's rows are a sublane-aligned (BP, IP) slab.
    xp = jnp.zeros((BP, T, IN_PAD), jnp.float32).at[:B, :, :I].set(x)
    x_tb = jnp.swapaxes(xp, 0, 1).reshape(T * BP, IN_PAD).astype(mxu_dtype)

    # TODO(synk): for larger batches on v7x, add a leading batch grid axis
    # (blocks of >=8 rows, dimension_semantics=("parallel",)) so the second
    # TensorCore takes half the batch; at B=2 a single gridless call is best.
    kernel = functools.partial(lstm_kernel, T=T, BP=BP)
    vmem = pl.BlockSpec(memory_space=pltpu.MemorySpace.VMEM)

    out_pad = pl.pallas_call(
        kernel,
        out_shape=jax.ShapeDtypeStruct((BP, OUT_PAD), jnp.float32),
        in_specs=[vmem] * 6,
        out_specs=vmem,
        scratch_shapes=[pltpu.VMEM((T, BP, 4 * HIDDEN_PAD), jnp.float32)],
    )(x_tb, w_ih_p, w_hh_p, b_p, w_out_p, b_out_p)

    # Only the first B rows / OUT_DIM columns are real (padded rows are
    # row-independent and simply discarded here).
    return out_pad[:B, :OUT_DIM]


def rnn_reference(x, w_ih, w_hh, b_ih, b_hh, w_out, b_out):
    """Pure-JAX f32 reference of PyTorch nn.LSTM + Linear forward."""
    B, T, I = x.shape
    H = HIDDEN

    def step(carry, x_t):
        h, c = carry
        gates = x_t @ w_ih.T + b_ih + h @ w_hh.T + b_hh
        i_g = jax.nn.sigmoid(gates[:, 0 * H:1 * H])
        f_g = jax.nn.sigmoid(gates[:, 1 * H:2 * H])
        g_g = jnp.tanh(gates[:, 2 * H:3 * H])
        o_g = jax.nn.sigmoid(gates[:, 3 * H:4 * H])
        c = f_g * c + i_g * g_g
        h = o_g * jnp.tanh(c)
        return (h, c), None

    h0 = jnp.zeros((B, H), jnp.float32)
    c0 = jnp.zeros((B, H), jnp.float32)
    (h_n, _), _ = lax.scan(step, (h0, c0), jnp.swapaxes(x, 0, 1))
    return h_n @ w_out.T + b_out


if __name__ == "__main__":
    key = jax.random.PRNGKey(0)
    ks = jax.random.split(key, 7)

    B, T, I, H = 2, 8, INPUT_SIZE, HIDDEN
    # PyTorch init scale: U(-1/sqrt(H), 1/sqrt(H)) — deterministic synthetic params.
    s = 1.0 / np.sqrt(H)
    x = jax.random.normal(ks[0], (B, T, I), dtype=jnp.float32)
    w_ih = jax.random.uniform(ks[1], (4 * H, I), jnp.float32, -s, s)
    w_hh = jax.random.uniform(ks[2], (4 * H, H), jnp.float32, -s, s)
    b_ih = jax.random.uniform(ks[3], (4 * H,), jnp.float32, -s, s)
    b_hh = jax.random.uniform(ks[4], (4 * H,), jnp.float32, -s, s)
    w_out = jax.random.uniform(ks[5], (OUT_DIM, H), jnp.float32, -s, s)
    b_out = jax.random.uniform(ks[6], (OUT_DIM,), jnp.float32, -s, s)

    ref = rnn_reference(x, w_ih, w_hh, b_ih, b_hh, w_out, b_out)
    fwd = jax.jit(rnn_forward)

    # (1) f32-MXU variant: validates exact kernel semantics vs the f32 reference.
    packed_f32 = pack_params(w_ih, w_hh, b_ih, b_hh, w_out, b_out,
                             mxu_dtype=jnp.float32)
    out_f32 = jax.block_until_ready(fwd(x, packed_f32))
    np.testing.assert_allclose(np.asarray(out_f32), np.asarray(ref),
                               rtol=1e-4, atol=1e-4)

    # (2) bf16-MXU variant (perf default on v5e/v6e/v7x): f32 accumulation and
    #     f32 gate math; tolerance reflects bf16 operand rounding (~2^-9 rel)
    #     propagated through the 8-step recurrence.
    packed_bf16 = pack_params(w_ih, w_hh, b_ih, b_hh, w_out, b_out,
                              mxu_dtype=jnp.bfloat16)
    out_bf16 = jax.block_until_ready(fwd(x, packed_bf16))
    np.testing.assert_allclose(np.asarray(out_bf16), np.asarray(ref),
                               rtol=2e-2, atol=5e-3)

    assert out_bf16.shape == (B, OUT_DIM)
    print("KERNEL_OK")
</pallas_src>

<mosaic_0001>
module attributes {stable_mosaic.version = 11 : i64} {
  func.func @lstm_kernel(%arg0: memref<64x128xf32, #tpu.memory_space<vmem>>, %arg1: memref<128x512xf32, #tpu.memory_space<vmem>>, %arg2: memref<128x512xf32, #tpu.memory_space<vmem>>, %arg3: memref<1x512xf32, #tpu.memory_space<vmem>>, %arg4: memref<128x128xf32, #tpu.memory_space<vmem>>, %arg5: memref<1x128xf32, #tpu.memory_space<vmem>>, %arg6: memref<8x128xf32, #tpu.memory_space<vmem>>, %arg7: memref<8x8x512xf32, #tpu.memory_space<vmem>>) attributes {dimension_semantics = [], scalar_prefetch = 0 : i64, scratch_operands = 1 : i64, tpu.core_type = #tpu.core_type<tc>} {
    %c0 = arith.constant 0 : index
    %c0_0 = arith.constant 0 : index
    %0 = vector.load %arg0[%c0, %c0_0] : memref<64x128xf32, #tpu.memory_space<vmem>>, vector<64x128xf32>
    %c0_1 = arith.constant 0 : index
    %c0_2 = arith.constant 0 : index
    %1 = vector.load %arg1[%c0_1, %c0_2] : memref<128x512xf32, #tpu.memory_space<vmem>>, vector<128x512xf32>
    %cst = arith.constant dense<0.000000e+00> : vector<64x512xf32>
    %2 = tpu.matmul %0, %1, %cst {dimension_numbers = #tpu.dot_dimension_numbers<[1], [0], [0], [1], [0, 0, 1, 1], [], []>} : vector<64x128xf32>, vector<128x512xf32>, vector<64x512xf32> -> vector<64x512xf32>
    %c0_3 = arith.constant 0 : index
    %c0_4 = arith.constant 0 : index
    %3 = vector.load %arg3[%c0_3, %c0_4] : memref<1x512xf32, #tpu.memory_space<vmem>>, vector<1x512xf32>
    %4 = vector.broadcast %3 : vector<1x512xf32> to vector<64x512xf32>
    %5 = arith.addf %2, %4 : vector<64x512xf32>
    %6 = vector.extract_strided_slice %5 {offsets = [0, 0], sizes = [8, 512], strides = [1, 1]} : vector<64x512xf32> to vector<8x512xf32>
    %c0_5 = arith.constant 0 : index
    %c0_6 = arith.constant 0 : index
    %c0_7 = arith.constant 0 : index
    %7 = vector.load %arg7[%c0_5, %c0_6, %c0_7] : memref<8x8x512xf32, #tpu.memory_space<vmem>>, vector<1x8x512xf32>
    %8 = vector.shape_cast %7 : vector<1x8x512xf32> to vector<8x512xf32>
    %9 = vector.shape_cast %6 : vector<8x512xf32> to vector<1x8x512xf32>
    tpu.vector_store %arg7[%c0_5, %c0_6, %c0_7], %9 {strides = array<i32>} : memref<8x8x512xf32, #tpu.memory_space<vmem>>, vector<1x8x512xf32>,
    %10 = vector.extract_strided_slice %5 {offsets = [8, 0], sizes = [8, 512], strides = [1, 1]} : vector<64x512xf32> to vector<8x512xf32>
    %c1 = arith.constant 1 : index
    %c0_8 = arith.constant 0 : index
    %c0_9 = arith.constant 0 : index
    %11 = vector.load %arg7[%c1, %c0_8, %c0_9] : memref<8x8x512xf32, #tpu.memory_space<vmem>>, vector<1x8x512xf32>
    %12 = vector.shape_cast %11 : vector<1x8x512xf32> to vector<8x512xf32>
    %13 = vector.shape_cast %10 : vector<8x512xf32> to vector<1x8x512xf32>
    tpu.vector_store %arg7[%c1, %c0_8, %c0_9], %13 {strides = array<i32>} : memref<8x8x512xf32, #tpu.memory_space<vmem>>, vector<1x8x512xf32>,
    %14 = vector.extract_strided_slice %5 {offsets = [16, 0], sizes = [8, 512], strides = [1, 1]} : vector<64x512xf32> to vector<8x512xf32>
    %c2 = arith.constant 2 : index
    %c0_10 = arith.constant 0 : index
    %c0_11 = arith.constant 0 : index
    %15 = vector.load %arg7[%c2, %c0_10, %c0_11] : memref<8x8x512xf32, #tpu.memory_space<vmem>>, vector<1x8x512xf32>
    %16 = vector.shape_cast %15 : vector<1x8x512xf32> to vector<8x512xf32>
    %17 = vector.shape_cast %14 : vector<8x512xf32> to vector<1x8x512xf32>
    tpu.vector_store %arg7[%c2, %c0_10, %c0_11], %17 {strides = array<i32>} : memref<8x8x512xf32, #tpu.memory_space<vmem>>, vector<1x8x512xf32>,
    %18 = vector.extract_strided_slice %5 {offsets = [24, 0], sizes = [8, 512], strides = [1, 1]} : vector<64x512xf32> to vector<8x512xf32>
    %c3 = arith.constant 3 : index
    %c0_12 = arith.constant 0 : index
    %c0_13 = arith.constant 0 : index
    %19 = vector.load %arg7[%c3, %c0_12, %c0_13] : memref<8x8x512xf32, #tpu.memory_space<vmem>>, vector<1x8x512xf32>
    %20 = vector.shape_cast %19 : vector<1x8x512xf32> to vector<8x512xf32>
    %21 = vector.shape_cast %18 : vector<8x512xf32> to vector<1x8x512xf32>
    tpu.vector_store %arg7[%c3, %c0_12, %c0_13], %21 {strides = array<i32>} : memref<8x8x512xf32, #tpu.memory_space<vmem>>, vector<1x8x512xf32>,
    %22 = vector.extract_strided_slice %5 {offsets = [32, 0], sizes = [8, 512], strides = [1, 1]} : vector<64x512xf32> to vector<8x512xf32>
    %c4 = arith.constant 4 : index
    %c0_14 = arith.constant 0 : index
    %c0_15 = arith.constant 0 : index
    %23 = vector.load %arg7[%c4, %c0_14, %c0_15] : memref<8x8x512xf32, #tpu.memory_space<vmem>>, vector<1x8x512xf32>
    %24 = vector.shape_cast %23 : vector<1x8x512xf32> to vector<8x512xf32>
    %25 = vector.shape_cast %22 : vector<8x512xf32> to vector<1x8x512xf32>
    tpu.vector_store %arg7[%c4, %c0_14, %c0_15], %25 {strides = array<i32>} : memref<8x8x512xf32, #tpu.memory_space<vmem>>, vector<1x8x512xf32>,
    %26 = vector.extract_strided_slice %5 {offsets = [40, 0], sizes = [8, 512], strides = [1, 1]} : vector<64x512xf32> to vector<8x512xf32>
    %c5 = arith.constant 5 : index
    %c0_16 = arith.constant 0 : index
    %c0_17 = arith.constant 0 : index
    %27 = vector.load %arg7[%c5, %c0_16, %c0_17] : memref<8x8x512xf32, #tpu.memory_space<vmem>>, vector<1x8x512xf32>
    %28 = vector.shape_cast %27 : vector<1x8x512xf32> to vector<8x512xf32>
    %29 = vector.shape_cast %26 : vector<8x512xf32> to vector<1x8x512xf32>
    tpu.vector_store %arg7[%c5, %c0_16, %c0_17], %29 {strides = array<i32>} : memref<8x8x512xf32, #tpu.memory_space<vmem>>, vector<1x8x512xf32>,
    %30 = vector.extract_strided_slice %5 {offsets = [48, 0], sizes = [8, 512], strides = [1, 1]} : vector<64x512xf32> to vector<8x512xf32>
    %c6 = arith.constant 6 : index
    %c0_18 = arith.constant 0 : index
    %c0_19 = arith.constant 0 : index
    %31 = vector.load %arg7[%c6, %c0_18, %c0_19] : memref<8x8x512xf32, #tpu.memory_space<vmem>>, vector<1x8x512xf32>
    %32 = vector.shape_cast %31 : vector<1x8x512xf32> to vector<8x512xf32>
    %33 = vector.shape_cast %30 : vector<8x512xf32> to vector<1x8x512xf32>
    tpu.vector_store %arg7[%c6, %c0_18, %c0_19], %33 {strides = array<i32>} : memref<8x8x512xf32, #tpu.memory_space<vmem>>, vector<1x8x512xf32>,
    %34 = vector.extract_strided_slice %5 {offsets = [56, 0], sizes = [8, 512], strides = [1, 1]} : vector<64x512xf32> to vector<8x512xf32>
    %c7 = arith.constant 7 : index
    %c0_20 = arith.constant 0 : index
    %c0_21 = arith.constant 0 : index
    %35 = vector.load %arg7[%c7, %c0_20, %c0_21] : memref<8x8x512xf32, #tpu.memory_space<vmem>>, vector<1x8x512xf32>
    %36 = vector.shape_cast %35 : vector<1x8x512xf32> to vector<8x512xf32>
    %37 = vector.shape_cast %34 : vector<8x512xf32> to vector<1x8x512xf32>
    tpu.vector_store %arg7[%c7, %c0_20, %c0_21], %37 {strides = array<i32>} : memref<8x8x512xf32, #tpu.memory_space<vmem>>, vector<1x8x512xf32>,
    %cst_22 = arith.constant 0.000000e+00 : f32
    %38 = vector.broadcast %cst_22 : f32 to vector<8x128xf32>
    %cst_23 = arith.constant 0.000000e+00 : f32
    %39 = vector.broadcast %cst_23 : f32 to vector<8x128xf32>
    %c0_24 = arith.constant 0 : index
    %c0_25 = arith.constant 0 : index
    %c0_26 = arith.constant 0 : index
    %40 = vector.load %arg7[%c0_24, %c0_25, %c0_26] : memref<8x8x512xf32, #tpu.memory_space<vmem>>, vector<1x8x512xf32>
    %41 = vector.shape_cast %40 : vector<1x8x512xf32> to vector<8x512xf32>
    %c0_27 = arith.constant 0 : index
    %c0_28 = arith.constant 0 : index
    %42 = vector.load %arg2[%c0_27, %c0_28] : memref<128x512xf32, #tpu.memory_space<vmem>>, vector<128x512xf32>
    %cst_29 = arith.constant dense<0.000000e+00> : vector<8x512xf32>
    %43 = tpu.matmul %38, %42, %cst_29 {dimension_numbers = #tpu.dot_dimension_numbers<[1], [0], [0], [1], [0, 0, 1, 1], [], []>} : vector<8x128xf32>, vector<128x512xf32>, vector<8x512xf32> -> vector<8x512xf32>
    %44 = arith.addf %41, %43 : vector<8x512xf32>
    %45 = vector.extract_strided_slice %44 {offsets = [0, 0], sizes = [8, 128], strides = [1, 1]} : vector<8x512xf32> to vector<8x128xf32>
    %cst_30 = arith.constant 5.000000e-01 : f32
    %46 = vector.broadcast %cst_30 : f32 to vector<8x128xf32>
    %47 = arith.mulf %46, %45 : vector<8x128xf32>
    %48 = math.tanh %47 : vector<8x128xf32>
    %cst_31 = arith.constant 5.000000e-01 : f32
    %49 = vector.broadcast %cst_31 : f32 to vector<8x128xf32>
    %50 = arith.mulf %49, %48 : vector<8x128xf32>
    %cst_32 = arith.constant 5.000000e-01 : f32
    %51 = vector.broadcast %cst_32 : f32 to vector<8x128xf32>
    %52 = arith.addf %50, %51 : vector<8x128xf32>
    %53 = vector.extract_strided_slice %44 {offsets = [0, 128], sizes = [8, 128], strides = [1, 1]} : vector<8x512xf32> to vector<8x128xf32>
    %cst_33 = arith.constant 5.000000e-01 : f32
    %54 = vector.broadcast %cst_33 : f32 to vector<8x128xf32>
    %55 = arith.mulf %54, %53 : vector<8x128xf32>
    %56 = math.tanh %55 : vector<8x128xf32>
    %cst_34 = arith.constant 5.000000e-01 : f32
    %57 = vector.broadcast %cst_34 : f32 to vector<8x128xf32>
    %58 = arith.mulf %57, %56 : vector<8x128xf32>
    %cst_35 = arith.constant 5.000000e-01 : f32
    %59 = vector.broadcast %cst_35 : f32 to vector<8x128xf32>
    %60 = arith.addf %58, %59 : vector<8x128xf32>
    %61 = vector.extract_strided_slice %44 {offsets = [0, 256], sizes = [8, 128], strides = [1, 1]} : vector<8x512xf32> to vector<8x128xf32>
    %62 = math.tanh %61 : vector<8x128xf32>
    %63 = vector.extract_strided_slice %44 {offsets = [0, 384], sizes = [8, 128], strides = [1, 1]} : vector<8x512xf32> to vector<8x128xf32>
    %cst_36 = arith.constant 5.000000e-01 : f32
    %64 = vector.broadcast %cst_36 : f32 to vector<8x128xf32>
    %65 = arith.mulf %64, %63 : vector<8x128xf32>
    %66 = math.tanh %65 : vector<8x128xf32>
    %cst_37 = arith.constant 5.000000e-01 : f32
    %67 = vector.broadcast %cst_37 : f32 to vector<8x128xf32>
    %68 = arith.mulf %67, %66 : vector<8x128xf32>
    %cst_38 = arith.constant 5.000000e-01 : f32
    %69 = vector.broadcast %cst_38 : f32 to vector<8x128xf32>
    %70 = arith.addf %68, %69 : vector<8x128xf32>
    %71 = arith.mulf %60, %39 : vector<8x128xf32>
    %72 = arith.mulf %52, %62 : vector<8x128xf32>
    %73 = arith.addf %71, %72 : vector<8x128xf32>
    %74 = math.tanh %73 : vector<8x128xf32>
    %75 = arith.mulf %70, %74 : vector<8x128xf32>
    %c1_39 = arith.constant 1 : index
    %c0_40 = arith.constant 0 : index
    %c0_41 = arith.constant 0 : index
    %76 = vector.load %arg7[%c1_39, %c0_40, %c0_41] : memref<8x8x512xf32, #tpu.memory_space<vmem>>, vector<1x8x512xf32>
    %77 = vector.shape_cast %76 : vector<1x8x512xf32> to vector<8x512xf32>
    %c0_42 = arith.constant 0 : index
    %c0_43 = arith.constant 0 : index
    %78 = vector.load %arg2[%c0_42, %c0_43] : memref<128x512xf32, #tpu.memory_space<vmem>>, vector<128x512xf32>
    %cst_44 = arith.constant dense<0.000000e+00> : vector<8x512xf32>
    %79 = tpu.matmul %75, %78, %cst_44 {dimension_numbers = #tpu.dot_dimension_numbers<[1], [0], [0], [1], [0, 0, 1, 1], [], []>} : vector<8x128xf32>, vector<128x512xf32>, vector<8x512xf32> -> vector<8x512xf32>
    %80 = arith.addf %77, %79 : vector<8x512xf32>
    %81 = vector.extract_strided_slice %80 {offsets = [0, 0], sizes = [8, 128], strides = [1, 1]} : vector<8x512xf32> to vector<8x128xf32>
    %cst_45 = arith.constant 5.000000e-01 : f32
    %82 = vector.broadcast %cst_45 : f32 to vector<8x128xf32>
    %83 = arith.mulf %82, %81 : vector<8x128xf32>
    %84 = math.tanh %83 : vector<8x128xf32>
    %cst_46 = arith.constant 5.000000e-01 : f32
    %85 = vector.broadcast %cst_46 : f32 to vector<8x128xf32>
    %86 = arith.mulf %85, %84 : vector<8x128xf32>
    %cst_47 = arith.constant 5.000000e-01 : f32
    %87 = vector.broadcast %cst_47 : f32 to vector<8x128xf32>
    %88 = arith.addf %86, %87 : vector<8x128xf32>
    %89 = vector.extract_strided_slice %80 {offsets = [0, 128], sizes = [8, 128], strides = [1, 1]} : vector<8x512xf32> to vector<8x128xf32>
    %cst_48 = arith.constant 5.000000e-01 : f32
    %90 = vector.broadcast %cst_48 : f32 to vector<8x128xf32>
    %91 = arith.mulf %90, %89 : vector<8x128xf32>
    %92 = math.tanh %91 : vector<8x128xf32>
    %cst_49 = arith.constant 5.000000e-01 : f32
    %93 = vector.broadcast %cst_49 : f32 to vector<8x128xf32>
    %94 = arith.mulf %93, %92 : vector<8x128xf32>
    %cst_50 = arith.constant 5.000000e-01 : f32
    %95 = vector.broadcast %cst_50 : f32 to vector<8x128xf32>
    %96 = arith.addf %94, %95 : vector<8x128xf32>
    %97 = vector.extract_strided_slice %80 {offsets = [0, 256], sizes = [8, 128], strides = [1, 1]} : vector<8x512xf32> to vector<8x128xf32>
    %98 = math.tanh %97 : vector<8x128xf32>
    %99 = vector.extract_strided_slice %80 {offsets = [0, 384], sizes = [8, 128], strides = [1, 1]} : vector<8x512xf32> to vector<8x128xf32>
    %cst_51 = arith.constant 5.000000e-01 : f32
    %100 = vector.broadcast %cst_51 : f32 to vector<8x128xf32>
    %101 = arith.mulf %100, %99 : vector<8x128xf32>
    %102 = math.tanh %101 : vector<8x128xf32>
    %cst_52 = arith.constant 5.000000e-01 : f32
    %103 = vector.broadcast %cst_52 : f32 to vector<8x128xf32>
    %104 = arith.mulf %103, %102 : vector<8x128xf32>
    %cst_53 = arith.constant 5.000000e-01 : f32
    %105 = vector.broadcast %cst_53 : f32 to vector<8x128xf32>
    %106 = arith.addf %104, %105 : vector<8x128xf32>
    %107 = arith.mulf %96, %73 : vector<8x128xf32>
    %108 = arith.mulf %88, %98 : vector<8x128xf32>
    %109 = arith.addf %107, %108 : vector<8x128xf32>
    %110 = math.tanh %109 : vector<8x128xf32>
    %111 = arith.mulf %106, %110 : vector<8x128xf32>
    %c2_54 = arith.constant 2 : index
    %c0_55 = arith.constant 0 : index
    %c0_56 = arith.constant 0 : index
    %112 = vector.load %arg7[%c2_54, %c0_55, %c0_56] : memref<8x8x512xf32, #tpu.memory_space<vmem>>, vector<1x8x512xf32>
    %113 = vector.shape_cast %112 : vector<1x8x512xf32> to vector<8x512xf32>
    %c0_57 = arith.constant 0 : index
    %c0_58 = arith.constant 0 : index
    %114 = vector.load %arg2[%c0_57, %c0_58] : memref<128x512xf32, #tpu.memory_space<vmem>>, vector<128x512xf32>
    %cst_59 = arith.constant dense<0.000000e+00> : vector<8x512xf32>
    %115 = tpu.matmul %111, %114, %cst_59 {dimension_numbers = #tpu.dot_dimension_numbers<[1], [0], [0], [1], [0, 0, 1, 1], [], []>} : vector<8x128xf32>, vector<128x512xf32>, vector<8x512xf32> -> vector<8x512xf32>
    %116 = arith.addf %113, %115 : vector<8x512xf32>
    %117 = vector.extract_strided_slice %116 {offsets = [0, 0], sizes = [8, 128], strides = [1, 1]} : vector<8x512xf32> to vector<8x128xf32>
    %cst_60 = arith.constant 5.000000e-01 : f32
    %118 = vector.broadcast %cst_60 : f32 to vector<8x128xf32>
    %119 = arith.mulf %118, %117 : vector<8x128xf32>
    %120 = math.tanh %119 : vector<8x128xf32>
    %cst_61 = arith.constant 5.000000e-01 : f32
    %121 = vector.broadcast %cst_61 : f32 to vector<8x128xf32>
    %122 = arith.mulf %121, %120 : vector<8x128xf32>
    %cst_62 = arith.constant 5.000000e-01 : f32
    %123 = vector.broadcast %cst_62 : f32 to vector<8x128xf32>
    %124 = arith.addf %122, %123 : vector<8x128xf32>
    %125 = vector.extract_strided_slice %116 {offsets = [0, 128], sizes = [8, 128], strides = [1, 1]} : vector<8x512xf32> to vector<8x128xf32>
    %cst_63 = arith.constant 5.000000e-01 : f32
    %126 = vector.broadcast %cst_63 : f32 to vector<8x128xf32>
    %127 = arith.mulf %126, %125 : vector<8x128xf32>
    %128 = math.tanh %127 : vector<8x128xf32>
    %cst_64 = arith.constant 5.000000e-01 : f32
    %129 = vector.broadcast %cst_64 : f32 to vector<8x128xf32>
    %130 = arith.mulf %129, %128 : vector<8x128xf32>
    %cst_65 = arith.constant 5.000000e-01 : f32
    %131 = vector.broadcast %cst_65 : f32 to vector<8x128xf32>
    %132 = arith.addf %130, %131 : vector<8x128xf32>
    %133 = vector.extract_strided_slice %116 {offsets = [0, 256], sizes = [8, 128], strides = [1, 1]} : vector<8x512xf32> to vector<8x128xf32>
    %134 = math.tanh %133 : vector<8x128xf32>
    %135 = vector.extract_strided_slice %116 {offsets = [0, 384], sizes = [8, 128], strides = [1, 1]} : vector<8x512xf32> to vector<8x128xf32>
    %cst_66 = arith.constant 5.000000e-01 : f32
    %136 = vector.broadcast %cst_66 : f32 to vector<8x128xf32>
    %137 = arith.mulf %136, %135 : vector<8x128xf32>
    %138 = math.tanh %137 : vector<8x128xf32>
    %cst_67 = arith.constant 5.000000e-01 : f32
    %139 = vector.broadcast %cst_67 : f32 to vector<8x128xf32>
    %140 = arith.mulf %139, %138 : vector<8x128xf32>
    %cst_68 = arith.constant 5.000000e-01 : f32
    %141 = vector.broadcast %cst_68 : f32 to vector<8x128xf32>
    %142 = arith.addf %140, %141 : vector<8x128xf32>
    %143 = arith.mulf %132, %109 : vector<8x128xf32>
    %144 = arith.mulf %124, %134 : vector<8x128xf32>
    %145 = arith.addf %143, %144 : vector<8x128xf32>
    %146 = math.tanh %145 : vector<8x128xf32>
    %147 = arith.mulf %142, %146 : vector<8x128xf32>
    %c3_69 = arith.constant 3 : index
    %c0_70 = arith.constant 0 : index
    %c0_71 = arith.constant 0 : index
    %148 = vector.load %arg7[%c3_69, %c0_70, %c0_71] : memref<8x8x512xf32, #tpu.memory_space<vmem>>, vector<1x8x512xf32>
    %149 = vector.shape_cast %148 : vector<1x8x512xf32> to vector<8x512xf32>
    %c0_72 = arith.constant 0 : index
    %c0_73 = arith.constant 0 : index
    %150 = vector.load %arg2[%c0_72, %c0_73] : memref<128x512xf32, #tpu.memory_space<vmem>>, vector<128x512xf32>
    %cst_74 = arith.constant dense<0.000000e+00> : vector<8x512xf32>
    %151 = tpu.matmul %147, %150, %cst_74 {dimension_numbers = #tpu.dot_dimension_numbers<[1], [0], [0], [1], [0, 0, 1, 1], [], []>} : vector<8x128xf32>, vector<128x512xf32>, vector<8x512xf32> -> vector<8x512xf32>
    %152 = arith.addf %149, %151 : vector<8x512xf32>
    %153 = vector.extract_strided_slice %152 {offsets = [0, 0], sizes = [8, 128], strides = [1, 1]} : vector<8x512xf32> to vector<8x128xf32>
    %cst_75 = arith.constant 5.000000e-01 : f32
    %154 = vector.broadcast %cst_75 : f32 to vector<8x128xf32>
    %155 = arith.mulf %154, %153 : vector<8x128xf32>
    %156 = math.tanh %155 : vector<8x128xf32>
    %cst_76 = arith.constant 5.000000e-01 : f32
    %157 = vector.broadcast %cst_76 : f32 to vector<8x128xf32>
    %158 = arith.mulf %157, %156 : vector<8x128xf32>
    %cst_77 = arith.constant 5.000000e-01 : f32
    %159 = vector.broadcast %cst_77 : f32 to vector<8x128xf32>
    %160 = arith.addf %158, %159 : vector<8x128xf32>
    %161 = vector.extract_strided_slice %152 {offsets = [0, 128], sizes = [8, 128], strides = [1, 1]} : vector<8x512xf32> to vector<8x128xf32>
    %cst_78 = arith.constant 5.000000e-01 : f32
    %162 = vector.broadcast %cst_78 : f32 to vector<8x128xf32>
    %163 = arith.mulf %162, %161 : vector<8x128xf32>
    %164 = math.tanh %163 : vector<8x128xf32>
    %cst_79 = arith.constant 5.000000e-01 : f32
    %165 = vector.broadcast %cst_79 : f32 to vector<8x128xf32>
    %166 = arith.mulf %165, %164 : vector<8x128xf32>
    %cst_80 = arith.constant 5.000000e-01 : f32
    %167 = vector.broadcast %cst_80 : f32 to vector<8x128xf32>
    %168 = arith.addf %166, %167 : vector<8x128xf32>
    %169 = vector.extract_strided_slice %152 {offsets = [0, 256], sizes = [8, 128], strides = [1, 1]} : vector<8x512xf32> to vector<8x128xf32>
    %170 = math.tanh %169 : vector<8x128xf32>
    %171 = vector.extract_strided_slice %152 {offsets = [0, 384], sizes = [8, 128], strides = [1, 1]} : vector<8x512xf32> to vector<8x128xf32>
    %cst_81 = arith.constant 5.000000e-01 : f32
    %172 = vector.broadcast %cst_81 : f32 to vector<8x128xf32>
    %173 = arith.mulf %172, %171 : vector<8x128xf32>
    %174 = math.tanh %173 : vector<8x128xf32>
    %cst_82 = arith.constant 5.000000e-01 : f32
    %175 = vector.broadcast %cst_82 : f32 to vector<8x128xf32>
    %176 = arith.mulf %175, %174 : vector<8x128xf32>
    %cst_83 = arith.constant 5.000000e-01 : f32
    %177 = vector.broadcast %cst_83 : f32 to vector<8x128xf32>
    %178 = arith.addf %176, %177 : vector<8x128xf32>
    %179 = arith.mulf %168, %145 : vector<8x128xf32>
    %180 = arith.mulf %160, %170 : vector<8x128xf32>
    %181 = arith.addf %179, %180 : vector<8x128xf32>
    %182 = math.tanh %181 : vector<8x128xf32>
    %183 = arith.mulf %178, %182 : vector<8x128xf32>
    %c4_84 = arith.constant 4 : index
    %c0_85 = arith.constant 0 : index
    %c0_86 = arith.constant 0 : index
    %184 = vector.load %arg7[%c4_84, %c0_85, %c0_86] : memref<8x8x512xf32, #tpu.memory_space<vmem>>, vector<1x8x512xf32>
    %185 = vector.shape_cast %184 : vector<1x8x512xf32> to vector<8x512xf32>
    %c0_87 = arith.constant 0 : index
    %c0_88 = arith.constant 0 : index
    %186 = vector.load %arg2[%c0_87, %c0_88] : memref<128x512xf32, #tpu.memory_space<vmem>>, vector<128x512xf32>
    %cst_89 = arith.constant dense<0.000000e+00> : vector<8x512xf32>
    %187 = tpu.matmul %183, %186, %cst_89 {dimension_numbers = #tpu.dot_dimension_numbers<[1], [0], [0], [1], [0, 0, 1, 1], [], []>} : vector<8x128xf32>, vector<128x512xf32>, vector<8x512xf32> -> vector<8x512xf32>
    %188 = arith.addf %185, %187 : vector<8x512xf32>
    %189 = vector.extract_strided_slice %188 {offsets = [0, 0], sizes = [8, 128], strides = [1, 1]} : vector<8x512xf32> to vector<8x128xf32>
    %cst_90 = arith.constant 5.000000e-01 : f32
    %190 = vector.broadcast %cst_90 : f32 to vector<8x128xf32>
    %191 = arith.mulf %190, %189 : vector<8x128xf32>
    %192 = math.tanh %191 : vector<8x128xf32>
    %cst_91 = arith.constant 5.000000e-01 : f32
    %193 = vector.broadcast %cst_91 : f32 to vector<8x128xf32>
    %194 = arith.mulf %193, %192 : vector<8x128xf32>
    %cst_92 = arith.constant 5.000000e-01 : f32
    %195 = vector.broadcast %cst_92 : f32 to vector<8x128xf32>
    %196 = arith.addf %194, %195 : vector<8x128xf32>
    %197 = vector.extract_strided_slice %188 {offsets = [0, 128], sizes = [8, 128], strides = [1, 1]} : vector<8x512xf32> to vector<8x128xf32>
    %cst_93 = arith.constant 5.000000e-01 : f32
    %198 = vector.broadcast %cst_93 : f32 to vector<8x128xf32>
    %199 = arith.mulf %198, %197 : vector<8x128xf32>
    %200 = math.tanh %199 : vector<8x128xf32>
    %cst_94 = arith.constant 5.000000e-01 : f32
    %201 = vector.broadcast %cst_94 : f32 to vector<8x128xf32>
    %202 = arith.mulf %201, %200 : vector<8x128xf32>
    %cst_95 = arith.constant 5.000000e-01 : f32
    %203 = vector.broadcast %cst_95 : f32 to vector<8x128xf32>
    %204 = arith.addf %202, %203 : vector<8x128xf32>
    %205 = vector.extract_strided_slice %188 {offsets = [0, 256], sizes = [8, 128], strides = [1, 1]} : vector<8x512xf32> to vector<8x128xf32>
    %206 = math.tanh %205 : vector<8x128xf32>
    %207 = vector.extract_strided_slice %188 {offsets = [0, 384], sizes = [8, 128], strides = [1, 1]} : vector<8x512xf32> to vector<8x128xf32>
    %cst_96 = arith.constant 5.000000e-01 : f32
    %208 = vector.broadcast %cst_96 : f32 to vector<8x128xf32>
    %209 = arith.mulf %208, %207 : vector<8x128xf32>
    %210 = math.tanh %209 : vector<8x128xf32>
    %cst_97 = arith.constant 5.000000e-01 : f32
    %211 = vector.broadcast %cst_97 : f32 to vector<8x128xf32>
    %212 = arith.mulf %211, %210 : vector<8x128xf32>
    %cst_98 = arith.constant 5.000000e-01 : f32
    %213 = vector.broadcast %cst_98 : f32 to vector<8x128xf32>
    %214 = arith.addf %212, %213 : vector<8x128xf32>
    %215 = arith.mulf %204, %181 : vector<8x128xf32>
    %216 = arith.mulf %196, %206 : vector<8x128xf32>
    %217 = arith.addf %215, %216 : vector<8x128xf32>
    %218 = math.tanh %217 : vector<8x128xf32>
    %219 = arith.mulf %214, %218 : vector<8x128xf32>
    %c5_99 = arith.constant 5 : index
    %c0_100 = arith.constant 0 : index
    %c0_101 = arith.constant 0 : index
    %220 = vector.load %arg7[%c5_99, %c0_100, %c0_101] : memref<8x8x512xf32, #tpu.memory_space<vmem>>, vector<1x8x512xf32>
    %221 = vector.shape_cast %220 : vector<1x8x512xf32> to vector<8x512xf32>
    %c0_102 = arith.constant 0 : index
    %c0_103 = arith.constant 0 : index
    %222 = vector.load %arg2[%c0_102, %c0_103] : memref<128x512xf32, #tpu.memory_space<vmem>>, vector<128x512xf32>
    %cst_104 = arith.constant dense<0.000000e+00> : vector<8x512xf32>
    %223 = tpu.matmul %219, %222, %cst_104 {dimension_numbers = #tpu.dot_dimension_numbers<[1], [0], [0], [1], [0, 0, 1, 1], [], []>} : vector<8x128xf32>, vector<128x512xf32>, vector<8x512xf32> -> vector<8x512xf32>
    %224 = arith.addf %221, %223 : vector<8x512xf32>
    %225 = vector.extract_strided_slice %224 {offsets = [0, 0], sizes = [8, 128], strides = [1, 1]} : vector<8x512xf32> to vector<8x128xf32>
    %cst_105 = arith.constant 5.000000e-01 : f32
    %226 = vector.broadcast %cst_105 : f32 to vector<8x128xf32>
    %227 = arith.mulf %226, %225 : vector<8x128xf32>
    %228 = math.tanh %227 : vector<8x128xf32>
    %cst_106 = arith.constant 5.000000e-01 : f32
    %229 = vector.broadcast %cst_106 : f32 to vector<8x128xf32>
    %230 = arith.mulf %229, %228 : vector<8x128xf32>
    %cst_107 = arith.constant 5.000000e-01 : f32
    %231 = vector.broadcast %cst_107 : f32 to vector<8x128xf32>
    %232 = arith.addf %230, %231 : vector<8x128xf32>
    %233 = vector.extract_strided_slice %224 {offsets = [0, 128], sizes = [8, 128], strides = [1, 1]} : vector<8x512xf32> to vector<8x128xf32>
    %cst_108 = arith.constant 5.000000e-01 : f32
    %234 = vector.broadcast %cst_108 : f32 to vector<8x128xf32>
    %235 = arith.mulf %234, %233 : vector<8x128xf32>
    %236 = math.tanh %235 : vector<8x128xf32>
    %cst_109 = arith.constant 5.000000e-01 : f32
    %237 = vector.broadcast %cst_109 : f32 to vector<8x128xf32>
    %238 = arith.mulf %237, %236 : vector<8x128xf32>
    %cst_110 = arith.constant 5.000000e-01 : f32
    %239 = vector.broadcast %cst_110 : f32 to vector<8x128xf32>
    %240 = arith.addf %238, %239 : vector<8x128xf32>
    %241 = vector.extract_strided_slice %224 {offsets = [0, 256], sizes = [8, 128], strides = [1, 1]} : vector<8x512xf32> to vector<8x128xf32>
    %242 = math.tanh %241 : vector<8x128xf32>
    %243 = vector.extract_strided_slice %224 {offsets = [0, 384], sizes = [8, 128], strides = [1, 1]} : vector<8x512xf32> to vector<8x128xf32>
    %cst_111 = arith.constant 5.000000e-01 : f32
    %244 = vector.broadcast %cst_111 : f32 to vector<8x128xf32>
    %245 = arith.mulf %244, %243 : vector<8x128xf32>
    %246 = math.tanh %245 : vector<8x128xf32>
    %cst_112 = arith.constant 5.000000e-01 : f32
    %247 = vector.broadcast %cst_112 : f32 to vector<8x128xf32>
    %248 = arith.mulf %247, %246 : vector<8x128xf32>
    %cst_113 = arith.constant 5.000000e-01 : f32
    %249 = vector.broadcast %cst_113 : f32 to vector<8x128xf32>
    %250 = arith.addf %248, %249 : vector<8x128xf32>
    %251 = arith.mulf %240, %217 : vector<8x128xf32>
    %252 = arith.mulf %232, %242 : vector<8x128xf32>
    %253 = arith.addf %251, %252 : vector<8x128xf32>
    %254 = math.tanh %253 : vector<8x128xf32>
    %255 = arith.mulf %250, %254 : vector<8x128xf32>
    %c6_114 = arith.constant 6 : index
    %c0_115 = arith.constant 0 : index
    %c0_116 = arith.constant 0 : index
    %256 = vector.load %arg7[%c6_114, %c0_115, %c0_116] : memref<8x8x512xf32, #tpu.memory_space<vmem>>, vector<1x8x512xf32>
    %257 = vector.shape_cast %256 : vector<1x8x512xf32> to vector<8x512xf32>
    %c0_117 = arith.constant 0 : index
    %c0_118 = arith.constant 0 : index
    %258 = vector.load %arg2[%c0_117, %c0_118] : memref<128x512xf32, #tpu.memory_space<vmem>>, vector<128x512xf32>
    %cst_119 = arith.constant dense<0.000000e+00> : vector<8x512xf32>
    %259 = tpu.matmul %255, %258, %cst_119 {dimension_numbers = #tpu.dot_dimension_numbers<[1], [0], [0], [1], [0, 0, 1, 1], [], []>} : vector<8x128xf32>, vector<128x512xf32>, vector<8x512xf32> -> vector<8x512xf32>
    %260 = arith.addf %257, %259 : vector<8x512xf32>
    %261 = vector.extract_strided_slice %260 {offsets = [0, 0], sizes = [8, 128], strides = [1, 1]} : vector<8x512xf32> to vector<8x128xf32>
    %cst_120 = arith.constant 5.000000e-01 : f32
    %262 = vector.broadcast %cst_120 : f32 to vector<8x128xf32>
    %263 = arith.mulf %262, %261 : vector<8x128xf32>
    %264 = math.tanh %263 : vector<8x128xf32>
    %cst_121 = arith.constant 5.000000e-01 : f32
    %265 = vector.broadcast %cst_121 : f32 to vector<8x128xf32>
    %266 = arith.mulf %265, %264 : vector<8x128xf32>
    %cst_122 = arith.constant 5.000000e-01 : f32
    %267 = vector.broadcast %cst_122 : f32 to vector<8x128xf32>
    %268 = arith.addf %266, %267 : vector<8x128xf32>
    %269 = vector.extract_strided_slice %260 {offsets = [0, 128], sizes = [8, 128], strides = [1, 1]} : vector<8x512xf32> to vector<8x128xf32>
    %cst_123 = arith.constant 5.000000e-01 : f32
    %270 = vector.broadcast %cst_123 : f32 to vector<8x128xf32>
    %271 = arith.mulf %270, %269 : vector<8x128xf32>
    %272 = math.tanh %271 : vector<8x128xf32>
    %cst_124 = arith.constant 5.000000e-01 : f32
    %273 = vector.broadcast %cst_124 : f32 to vector<8x128xf32>
    %274 = arith.mulf %273, %272 : vector<8x128xf32>
    %cst_125 = arith.constant 5.000000e-01 : f32
    %275 = vector.broadcast %cst_125 : f32 to vector<8x128xf32>
    %276 = arith.addf %274, %275 : vector<8x128xf32>
    %277 = vector.extract_strided_slice %260 {offsets = [0, 256], sizes = [8, 128], strides = [1, 1]} : vector<8x512xf32> to vector<8x128xf32>
    %278 = math.tanh %277 : vector<8x128xf32>
    %279 = vector.extract_strided_slice %260 {offsets = [0, 384], sizes = [8, 128], strides = [1, 1]} : vector<8x512xf32> to vector<8x128xf32>
    %cst_126 = arith.constant 5.000000e-01 : f32
    %280 = vector.broadcast %cst_126 : f32 to vector<8x128xf32>
    %281 = arith.mulf %280, %279 : vector<8x128xf32>
    %282 = math.tanh %281 : vector<8x128xf32>
    %cst_127 = arith.constant 5.000000e-01 : f32
    %283 = vector.broadcast %cst_127 : f32 to vector<8x128xf32>
    %284 = arith.mulf %283, %282 : vector<8x128xf32>
    %cst_128 = arith.constant 5.000000e-01 : f32
    %285 = vector.broadcast %cst_128 : f32 to vector<8x128xf32>
    %286 = arith.addf %284, %285 : vector<8x128xf32>
    %287 = arith.mulf %276, %253 : vector<8x128xf32>
    %288 = arith.mulf %268, %278 : vector<8x128xf32>
    %289 = arith.addf %287, %288 : vector<8x128xf32>
    %290 = math.tanh %289 : vector<8x128xf32>
    %291 = arith.mulf %286, %290 : vector<8x128xf32>
    %c7_129 = arith.constant 7 : index
    %c0_130 = arith.constant 0 : index
    %c0_131 = arith.constant 0 : index
    %292 = vector.load %arg7[%c7_129, %c0_130, %c0_131] : memref<8x8x512xf32, #tpu.memory_space<vmem>>, vector<1x8x512xf32>
    %293 = vector.shape_cast %292 : vector<1x8x512xf32> to vector<8x512xf32>
    %c0_132 = arith.constant 0 : index
    %c0_133 = arith.constant 0 : index
    %294 = vector.load %arg2[%c0_132, %c0_133] : memref<128x512xf32, #tpu.memory_space<vmem>>, vector<128x512xf32>
    %cst_134 = arith.constant dense<0.000000e+00> : vector<8x512xf32>
    %295 = tpu.matmul %291, %294, %cst_134 {dimension_numbers = #tpu.dot_dimension_numbers<[1], [0], [0], [1], [0, 0, 1, 1], [], []>} : vector<8x128xf32>, vector<128x512xf32>, vector<8x512xf32> -> vector<8x512xf32>
    %296 = arith.addf %293, %295 : vector<8x512xf32>
    %297 = vector.extract_strided_slice %296 {offsets = [0, 0], sizes = [8, 128], strides = [1, 1]} : vector<8x512xf32> to vector<8x128xf32>
    %cst_135 = arith.constant 5.000000e-01 : f32
    %298 = vector.broadcast %cst_135 : f32 to vector<8x128xf32>
    %299 = arith.mulf %298, %297 : vector<8x128xf32>
    %300 = math.tanh %299 : vector<8x128xf32>
    %cst_136 = arith.constant 5.000000e-01 : f32
    %301 = vector.broadcast %cst_136 : f32 to vector<8x128xf32>
    %302 = arith.mulf %301, %300 : vector<8x128xf32>
    %cst_137 = arith.constant 5.000000e-01 : f32
    %303 = vector.broadcast %cst_137 : f32 to vector<8x128xf32>
    %304 = arith.addf %302, %303 : vector<8x128xf32>
    %305 = vector.extract_strided_slice %296 {offsets = [0, 128], sizes = [8, 128], strides = [1, 1]} : vector<8x512xf32> to vector<8x128xf32>
    %cst_138 = arith.constant 5.000000e-01 : f32
    %306 = vector.broadcast %cst_138 : f32 to vector<8x128xf32>
    %307 = arith.mulf %306, %305 : vector<8x128xf32>
    %308 = math.tanh %307 : vector<8x128xf32>
    %cst_139 = arith.constant 5.000000e-01 : f32
    %309 = vector.broadcast %cst_139 : f32 to vector<8x128xf32>
    %310 = arith.mulf %309, %308 : vector<8x128xf32>
    %cst_140 = arith.constant 5.000000e-01 : f32
    %311 = vector.broadcast %cst_140 : f32 to vector<8x128xf32>
    %312 = arith.addf %310, %311 : vector<8x128xf32>
    %313 = vector.extract_strided_slice %296 {offsets = [0, 256], sizes = [8, 128], strides = [1, 1]} : vector<8x512xf32> to vector<8x128xf32>
    %314 = math.tanh %313 : vector<8x128xf32>
    %315 = vector.extract_strided_slice %296 {offsets = [0, 384], sizes = [8, 128], strides = [1, 1]} : vector<8x512xf32> to vector<8x128xf32>
    %cst_141 = arith.constant 5.000000e-01 : f32
    %316 = vector.broadcast %cst_141 : f32 to vector<8x128xf32>
    %317 = arith.mulf %316, %315 : vector<8x128xf32>
    %318 = math.tanh %317 : vector<8x128xf32>
    %cst_142 = arith.constant 5.000000e-01 : f32
    %319 = vector.broadcast %cst_142 : f32 to vector<8x128xf32>
    %320 = arith.mulf %319, %318 : vector<8x128xf32>
    %cst_143 = arith.constant 5.000000e-01 : f32
    %321 = vector.broadcast %cst_143 : f32 to vector<8x128xf32>
    %322 = arith.addf %320, %321 : vector<8x128xf32>
    %323 = arith.mulf %312, %289 : vector<8x128xf32>
    %324 = arith.mulf %304, %314 : vector<8x128xf32>
    %325 = arith.addf %323, %324 : vector<8x128xf32>
    %326 = math.tanh %325 : vector<8x128xf32>
    %327 = arith.mulf %322, %326 : vector<8x128xf32>
    %c0_144 = arith.constant 0 : index
    %c0_145 = arith.constant 0 : index
    %328 = vector.load %arg4[%c0_144, %c0_145] : memref<128x128xf32, #tpu.memory_space<vmem>>, vector<128x128xf32>
    %cst_146 = arith.constant dense<0.000000e+00> : vector<8x128xf32>
    %329 = tpu.matmul %327, %328, %cst_146 {dimension_numbers = #tpu.dot_dimension_numbers<[1], [0], [0], [1], [0, 0, 1, 1], [], []>} : vector<8x128xf32>, vector<128x128xf32>, vector<8x128xf32> -> vector<8x128xf32>
    %c0_147 = arith.constant 0 : index
    %c0_148 = arith.constant 0 : index
    %330 = vector.load %arg5[%c0_147, %c0_148] : memref<1x128xf32, #tpu.memory_space<vmem>>, vector<1x128xf32>
    %331 = vector.broadcast %330 : vector<1x128xf32> to vector<8x128xf32>
    %332 = arith.addf %329, %331 : vector<8x128xf32>
    %c0_149 = arith.constant 0 : index
    %c0_150 = arith.constant 0 : index
    %333 = vector.load %arg6[%c0_149, %c0_150] : memref<8x128xf32, #tpu.memory_space<vmem>>, vector<8x128xf32>
    tpu.vector_store %arg6[%c0_149, %c0_150], %332 {strides = array<i32>} : memref<8x128xf32, #tpu.memory_space<vmem>>, vector<8x128xf32>,
    return
  }
}

</mosaic_0001>

<bundles_post_ra>
// kernel: rnn_forward.1
= control target key start
LH: loop header
LB: loop body
LE: loop exit
PB: predicated region body
PF: predicated region fallthrough
CT: control target
= control target key end

     0   :  { %11 = vsyncpa [#allocation4], 0  ;;  %s3340_s0 = inlined_call_operand.vmem [shape: f32[64,128], index: 0, kind: input, shape index: {}]   ;;  %s3341_s1 = inlined_call_operand.hbm [shape: f32[128,512], index: 1, kind: input, shape index: {}]   ;;  %s3342_s2 = inlined_call_operand.hbm [shape: f32[128,512], index: 2, kind: input, shape index: {}]   ;;  %s3343_s3 = inlined_call_operand.vmem [shape: f32[1,512], index: 3, kind: input, shape index: {}]   ;;  %s3344_s4 = inlined_call_operand.vmem [shape: f32[128,128], index: 4, kind: input, shape index: {}]   ;;  %s3345_s5 = inlined_call_operand.vmem [shape: f32[1,128], index: 5, kind: input, shape index: {}]   ;;  %s3346_s6 = inlined_call_operand.vmem [shape: f32[8,128], index: 6, kind: output, shape index: {}]  }
   0x1   :  { %12 = vsyncpa [#allocation6], 0  ;;  %s2770_s21 = smov [#allocation3]   ;;  %s2722_s25 = scalar_lea.hbm %s3341_s1, 8192 }
   0x2   :  { %s20_s22 = sshll.u32 %s2770_s21, 4  ;;  %p2723_p0 = scmp.ne.s32.totalorder %s3341_s1, %s2722_s25  ;;  %s21_s22 = int_to_ptr.vmem [resolvable:$true] %s20_s22 }
   0x3   :  { %p2726_p1 = scmp.lt.u32.totalorder %s2722_s25, %s3341_s1 }
   0x5   :  { %p2728_p2 = pnand %p2726_p1, %p2723_p0 }
   0x7   :  { %2731 = shalt.err (!%p2728_p2)
}
   0x8   :  { %s2732_s30 = scalar_lea.vmem %s21_s22, 8192  ;;  %p2737_p4 = scmp.lt.s32.totalorder %s21_s22, %s21_s22 }
   0x9   :  { %p2733_p3 = scmp.ne.s32.totalorder %s21_s22, %s2732_s30  ;;  %p2738_p5 = scmp.lt.s32.totalorder %s2732_s30, %s2732_s30 }
   0xb   :  { %p2739_p6 = por %p2738_p5, %p2737_p4 }
   0xd   :  { %p2740_p7 = pnand %p2739_p6, %p2733_p3 }
   0xf   :  { %2743 = shalt.err (!%p2740_p7)
}
  0x10   :  { %s2771_s7 = smov 512   ;;  %s2772_s8 = smov 32  }
  0x11   :  { %26 = dma.hbm_to_vmem [thread:$0]  %s3341_s1, 8192, %s21_s22, [#allocation4], %s2771_s7, %s2771_s7, %s2772_s8  }
  0x12   :  { %s2773_s11 = smov [#allocation5]   ;;  %s2744_s15 = scalar_lea.hbm %s3342_s2, 8192 }
  0x13   :  { %s32_s12 = sshll.u32 %s2773_s11, 4  ;;  %p2745_p8 = scmp.ne.s32.totalorder %s3342_s2, %s2744_s15  ;;  %s33_s12 = int_to_ptr.vmem [resolvable:$true] %s32_s12 }
  0x14   :  { %p2748_p9 = scmp.lt.u32.totalorder %s2744_s15, %s3342_s2 }
  0x16   :  { %p2750_p10 = pnand %p2748_p9, %p2745_p8 }
  0x18   :  { %2753 = shalt.err (!%p2750_p10)
}
  0x19   :  { %s2754_s20 = scalar_lea.vmem %s33_s12, 8192  ;;  %p2759_p12 = scmp.lt.s32.totalorder %s33_s12, %s33_s12 }
  0x1a   :  { %p2755_p11 = scmp.ne.s32.totalorder %s33_s12, %s2754_s20  ;;  %p2760_p13 = scmp.lt.s32.totalorder %s2754_s20, %s2754_s20 }
  0x1c   :  { %p2761_p0 = por %p2760_p13, %p2759_p12 }
  0x1e   :  { %p2762_p1 = pnand %p2761_p0, %p2755_p11 }
  0x20   :  { %2765 = shalt.err (!%p2762_p1)
}
  0x21   :  { %38 = dma.hbm_to_vmem [thread:$0]  %s3342_s2, 8192, %s33_s12, [#allocation6], %s2771_s7, %s2771_s7, %s2772_s8  }
  0x22   :  { %2766 = dma.done.wait [#allocation4], 8192  }
  0x23   :  { %2767 = vsyncadd [#allocation4], 4294959104 }
  0x24   :  { %2768 = dma.done.wait [#allocation6], 8192  }
  0x25   :  { %2769 = vsyncadd [#allocation6], 4294959104  ;;  %v2774_v0 = vmov 0.0   ;;  %v60_v1 = vld [vmem:[#allocation3 + $0x8] sm:$0xff]  ;;  %v62_v3 = vld [vmem:[#allocation3 + $0x18] sm:$0xff]  ;;  %vm2776_vm0 = vmmov 0  }
  0x26   :  { %209 = vmatprep.mubr.f32.mxu0 %v2774_v0  ;;  %322 = vmatprep.mubr.f32.mxu1 %v2774_v0  ;;  %v64_v2 = vld [vmem:[#allocation3 + $0x28] sm:$0xff]  ;;  %v66_v5 = vld [vmem:[#allocation3 + $0x38] sm:$0xff]  ;;  %v59_v6 = vld [vmem:[#allocation3] sm:$0xff] }
  0x27   :  { %v1971_v4 = vpack.c.bf16 %v64_v2, %v60_v1  ;;  %v63_v7 = vld [vmem:[#allocation3 + $0x20] sm:$0xff]  ;;  %v2003_v8 = vpack.c.bf16 %v66_v5, %v62_v3  ;;  %v61_v10 = vld [vmem:[#allocation3 + $0x10] sm:$0xff]  ;;  %v68_v12 = vld [vmem:[#allocation3 + $0x48] sm:$0xff] }
  0x28   :  { %v1973_v9 = vpack.c.bf16 %v63_v7, %v59_v6  ;;  %v65_v11 = vld [vmem:[#allocation3 + $0x30] sm:$0xff]  ;;  %v72_v14 = vld [vmem:[#allocation3 + $0x68] sm:$0xff]  ;;  %v70_v15 = vld [vmem:[#allocation3 + $0x58] sm:$0xff] }
  0x29   :  { %1972 = vmatprep.subr.bf16.mxu0 %v1971_v4  ;;  %v2005_v13 = vpack.c.bf16 %v65_v11, %v61_v10  ;;  %v74_v16 = vld [vmem:[#allocation3 + $0x78] sm:$0xff]  ;;  %2004 = vmatprep.subr.bf16.mxu1 %v2003_v8  ;;  %v1975_v17 = vpack.c.bf16 %v72_v14, %v68_v12  ;;  %v67_v19 = vld [vmem:[#allocation3 + $0x40] sm:$0xff]  ;;  %v69_v21 = vld [vmem:[#allocation3 + $0x50] sm:$0xff] }
  0x2a   :  { %1974 = vmatpush1.bf16.msra.mxu0 %v1973_v9  ;;  %v2007_v18 = vpack.c.bf16 %v74_v16, %v70_v15  ;;  %v71_v20 = vld [vmem:[#allocation3 + $0x60] sm:$0xff]  ;;  %v73_v23 = vld [vmem:[#allocation3 + $0x70] sm:$0xff]  ;;  %v76_v24 = vld [vmem:[#allocation3 + $0x88] sm:$0xff] }
  0x2b   :  { %2006 = vmatpush1.bf16.msra.mxu1 %v2005_v13  ;;  %v1977_v22 = vpack.c.bf16 %v71_v20, %v67_v19  ;;  %v80_v25 = vld [vmem:[#allocation3 + $0xa8] sm:$0xff]  ;;  %1976 = vmatprep.subr.bf16.mxu0 %v1975_v17  ;;  %v2009_v26 = vpack.c.bf16 %v73_v23, %v69_v21  ;;  %v78_v28 = vld [vmem:[#allocation3 + $0x98] sm:$0xff]  ;;  %v75_v30 = vld [vmem:[#allocation3 + $0x80] sm:$0xff] }
  0x2c   :  { %2008 = vmatprep.subr.bf16.mxu1 %v2007_v18  ;;  %v1979_v27 = vpack.c.bf16 %v80_v25, %v76_v24  ;;  %v82_v29 = vld [vmem:[#allocation3 + $0xb8] sm:$0xff]  ;;  %v79_v32 = vld [vmem:[#allocation3 + $0xa0] sm:$0xff]  ;;  %v77_v33 = vld [vmem:[#allocation3 + $0x90] sm:$0xff] }
  0x2d   :  { %v2011_v31 = vpack.c.bf16 %v82_v29, %v78_v28  ;;  %v81_v34 = vld [vmem:[#allocation3 + $0xb0] sm:$0xff]  ;;  %v1981_v35 = vpack.c.bf16 %v79_v32, %v75_v30  ;;  %v84_v36 = vld [vmem:[#allocation3 + $0xc8] sm:$0xff]  ;;  %v86_v38 = vld [vmem:[#allocation3 + $0xd8] sm:$0xff] }
  0x2e   :  { %1978 = vmatpush1.bf16.msra.mxu0 %v1977_v22  ;;  %v88_v37 = vld [vmem:[#allocation3 + $0xe8] sm:$0xff]  ;;  %v2013_v39 = vpack.c.bf16 %v81_v34, %v77_v33  ;;  %v90_v41 = vld [vmem:[#allocation3 + $0xf8] sm:$0xff]  ;;  %v83_v42 = vld [vmem:[#allocation3 + $0xc0] sm:$0xff] }
  0x2f   :  { %2010 = vmatpush1.bf16.msra.mxu1 %v2009_v26  ;;  %1980 = vmatprep.subr.bf16.mxu0 %v1979_v27  ;;  %v1983_v40 = vpack.c.bf16 %v88_v37, %v84_v36  ;;  %v87_v43 = vld [vmem:[#allocation3 + $0xe0] sm:$0xff]  ;;  %v2015_v44 = vpack.c.bf16 %v90_v41, %v86_v38  ;;  %v85_v45 = vld [vmem:[#allocation3 + $0xd0] sm:$0xff]  ;;  %v92_v47 = vld [vmem:[#allocation3 + $0x108] sm:$0xff] }
  0x30   :  { %2012 = vmatprep.subr.bf16.mxu1 %v2011_v31  ;;  %v89_v46 = vld [vmem:[#allocation3 + $0xf0] sm:$0xff]  ;;  %v96_v48 = vld [vmem:[#allocation3 + $0x128] sm:$0xff]  ;;  %v94_v49 = vld [vmem:[#allocation3 + $0x118] sm:$0xff]  ;;  %v1985_v51 = vpack.c.bf16 %v87_v43, %v83_v42 }
  0x31   :  { %v98_v50 = vld [vmem:[#allocation3 + $0x138] sm:$0xff]  ;;  %v2017_v52 = vpack.c.bf16 %v89_v46, %v85_v45  ;;  %v1987_v53 = vpack.c.bf16 %v96_v48, %v92_v47  ;;  %v91_v54 = vld [vmem:[#allocation3 + $0x100] sm:$0xff]  ;;  %v93_v56 = vld [vmem:[#allocation3 + $0x110] sm:$0xff] }
  0x32   :  { %1982 = vmatpush1.bf16.msra.mxu0 %v1981_v35  ;;  %v95_v55 = vld [vmem:[#allocation3 + $0x120] sm:$0xff]  ;;  %v2019_v57 = vpack.c.bf16 %v98_v50, %v94_v49  ;;  %v97_v58 = vld [vmem:[#allocation3 + $0x130] sm:$0xff]  ;;  %v100_v59 = vld [vmem:[#allocation3 + $0x148] sm:$0xff] }
  0x33   :  { %2014 = vmatpush1.bf16.msra.mxu1 %v2013_v39  ;;  %1984 = vmatprep.subr.bf16.mxu0 %v1983_v40  ;;  %v104_v60 = vld [vmem:[#allocation3 + $0x168] sm:$0xff]  ;;  %v102_v61 = vld [vmem:[#allocation3 + $0x158] sm:$0xff]  ;;  %v1989_v63 = vpack.c.bf16 %v95_v55, %v91_v54  ;;  %v2021_v1 = vpack.c.bf16 %v97_v58, %v93_v56  ;;  %v99_v3 = vld [vmem:[#allocation3 + $0x140] sm:$0xff] }
  0x34   :  { %2016 = vmatprep.subr.bf16.mxu1 %v2015_v44  ;;  %v106_v62 = vld [vmem:[#allocation3 + $0x178] sm:$0xff]  ;;  %v1991_v2 = vpack.c.bf16 %v104_v60, %v100_v59  ;;  %v103_v4 = vld [vmem:[#allocation3 + $0x160] sm:$0xff]  ;;  %v101_v5 = vld [vmem:[#allocation3 + $0x150] sm:$0xff] }
  0x35   :  { %v2023_v6 = vpack.c.bf16 %v106_v62, %v102_v61  ;;  %v105_v7 = vld [vmem:[#allocation3 + $0x170] sm:$0xff]  ;;  %v108_v8 = vld [vmem:[#allocation3 + $0x188] sm:$0xff]  ;;  %v110_v10 = vld [vmem:[#allocation3 + $0x198] sm:$0xff]  ;;  %v1993_v12 = vpack.c.bf16 %v103_v4, %v99_v3 }
  0x36   :  { %1986 = vmatpush1.bf16.msra.mxu0 %v1985_v51  ;;  %v112_v9 = vld [vmem:[#allocation3 + $0x1a8] sm:$0xff]  ;;  %v114_v11 = vld [vmem:[#allocation3 + $0x1b8] sm:$0xff]  ;;  %v2025_v13 = vpack.c.bf16 %v105_v7, %v101_v5  ;;  %v107_v15 = vld [vmem:[#allocation3 + $0x180] sm:$0xff] }
  0x37   :  { %2018 = vmatpush1.bf16.msra.mxu1 %v2017_v52  ;;  %1988 = vmatprep.subr.bf16.mxu0 %v1987_v53  ;;  %v1995_v14 = vpack.c.bf16 %v112_v9, %v108_v8  ;;  %v111_v16 = vld [vmem:[#allocation3 + $0x1a0] sm:$0xff]  ;;  %v109_v17 = vld [vmem:[#allocation3 + $0x190] sm:$0xff]  ;;  %v2027_v18 = vpack.c.bf16 %v114_v11, %v110_v10  ;;  %v116_v20 = vld [vmem:[#allocation3 + $0x1c8] sm:$0xff] }
  0x38   :  { %2020 = vmatprep.subr.bf16.mxu1 %v2019_v57  ;;  %v113_v19 = vld [vmem:[#allocation3 + $0x1b0] sm:$0xff]  ;;  %v120_v21 = vld [vmem:[#allocation3 + $0x1e8] sm:$0xff]  ;;  %v118_v22 = vld [vmem:[#allocation3 + $0x1d8] sm:$0xff]  ;;  %v1997_v24 = vpack.c.bf16 %v111_v16, %v107_v15 }
  0x39   :  { %v122_v23 = vld [vmem:[#allocation3 + $0x1f8] sm:$0xff]  ;;  %v2029_v25 = vpack.c.bf16 %v113_v19, %v109_v17  ;;  %v1999_v26 = vpack.c.bf16 %v120_v21, %v116_v20  ;;  %v115_v27 = vld [vmem:[#allocation3 + $0x1c0] sm:$0xff]  ;;  %v117_v29 = vld [vmem:[#allocation3 + $0x1d0] sm:$0xff] }
  0x3a   :  { %1990 = vmatpush1.bf16.msra.mxu0 %v1989_v63  ;;  %v119_v28 = vld [vmem:[#allocation3 + $0x1e0] sm:$0xff]  ;;  %v2031_v30 = vpack.c.bf16 %v122_v23, %v118_v22  ;;  %v121_v31 = vld [vmem:[#allocation3 + $0x1f0] sm:$0xff]  ;;  %v415_v32 = vld [vmem:[#allocation5 + $0x8] sm:$0xff] }
  0x3b   :  { %2022 = vmatpush1.bf16.msra.mxu1 %v2021_v1  ;;  %1992 = vmatprep.subr.bf16.mxu0 %v1991_v2  ;;  %v419_v33 = vld [vmem:[#allocation5 + $0x28] sm:$0xff]  ;;  %v417_v34 = vld [vmem:[#allocation5 + $0x18] sm:$0xff]  ;;  %v2001_v36 = vpack.c.bf16 %v119_v28, %v115_v27  ;;  %v2033_v37 = vpack.c.bf16 %v121_v31, %v117_v29  ;;  %v414_v39 = vld [vmem:[#allocation5] sm:$0xff] }
  0x3c   :  { %2024 = vmatprep.subr.bf16.mxu1 %v2023_v6  ;;  %v421_v35 = vld [vmem:[#allocation5 + $0x38] sm:$0xff]  ;;  %v2838_v38 = vpack.c.bf16 %v419_v33, %v415_v32  ;;  %v418_v40 = vld [vmem:[#allocation5 + $0x20] sm:$0xff]  ;;  %v416_v42 = vld [vmem:[#allocation5 + $0x10] sm:$0xff] }
  0x3d   :  { %v2840_v41 = vpack.c.bf16 %v421_v35, %v417_v34  ;;  %v420_v43 = vld [vmem:[#allocation5 + $0x30] sm:$0xff]  ;;  %v423_v44 = vld [vmem:[#allocation5 + $0x48] sm:$0xff]  ;;  %v51_v46 = vld [vmem:[%s3340_s0] sm:$0xff]  ;;  %v2845_v47 = vpack.c.bf16 %v418_v40, %v414_v39 }
  0x3e   :  { %1994 = vmatpush1.bf16.msra.mxu0 %v1993_v12  ;;  %v427_v45 = vld [vmem:[#allocation5 + $0x68] sm:$0xff]  ;;  %v425_v48 = vld [vmem:[#allocation5 + $0x58] sm:$0xff]  ;;  %v2848_v50 = vpack.c.bf16 %v420_v43, %v416_v42  ;;  %v422_v51 = vld [vmem:[#allocation5 + $0x40] sm:$0xff] }
  0x3f   :  { %2026 = vmatpush1.bf16.msra.mxu1 %v2025_v13  ;;  %1996 = vmatprep.subr.bf16.mxu0 %v1995_v14  ;;  %v429_v49 = vld [vmem:[#allocation5 + $0x78] sm:$0xff]  ;;  %v426_v52 = vld [vmem:[#allocation5 + $0x60] sm:$0xff]  ;;  %v2851_v53 = vpack.c.bf16 %v427_v45, %v423_v44  ;;  %v424_v54 = vld [vmem:[#allocation5 + $0x50] sm:$0xff] }
  0x40   :  { %2028 = vmatprep.subr.bf16.mxu1 %v2027_v18  ;;  %v428_v55 = vld [vmem:[#allocation5 + $0x70] sm:$0xff]  ;;  %v2853_v56 = vpack.c.bf16 %v429_v49, %v425_v48  ;;  %v431_v57 = vld [vmem:[#allocation5 + $0x88] sm:$0xff]  ;;  %v2859_v60 = vpack.c.bf16 %v426_v52, %v422_v51  ;;  %v433_v61 = vld [vmem:[#allocation5 + $0x98] sm:$0xff] }
  0x41   :  { %v435_v58 = vld [vmem:[#allocation5 + $0xa8] sm:$0xff]  ;;  %v437_v62 = vld [vmem:[#allocation5 + $0xb8] sm:$0xff]  ;;  %v2863_v63 = vpack.c.bf16 %v428_v55, %v424_v54  ;;  %v430_v1 = vld [vmem:[#allocation5 + $0x80] sm:$0xff] }
  0x42   :  { %1998 = vmatpush1.bf16.msra.mxu0 %v1997_v24  ;;  %v52_v59 = vld [vmem:[%s3340_s0 + $0x8] sm:$0xff]  ;;  %v434_v2 = vld [vmem:[#allocation5 + $0xa0] sm:$0xff]  ;;  %v2867_v3 = vpack.c.bf16 %v435_v58, %v431_v57  ;;  %v432_v4 = vld [vmem:[#allocation5 + $0x90] sm:$0xff]  ;;  %v2870_v6 = vpack.c.bf16 %v437_v62, %v433_v61 }
  0x43   :  { %2030 = vmatpush1.bf16.msra.mxu1 %v2029_v25  ;;  %2000 = vmatprep.subr.bf16.mxu0 %v1999_v26  ;;  %v436_v5 = vld [vmem:[#allocation5 + $0xb0] sm:$0xff]  ;;  %v439_v7 = vld [vmem:[#allocation5 + $0xc8] sm:$0xff]  ;;  %v2876_v10 = vpack.c.bf16 %v434_v2, %v430_v1  ;;  %v441_v11 = vld [vmem:[#allocation5 + $0xd8] sm:$0xff] }
  0x44   :  { %2032 = vmatprep.subr.bf16.mxu1 %v2031_v30  ;;  %v443_v8 = vld [vmem:[#allocation5 + $0xe8] sm:$0xff]  ;;  %v53_v9 = vld [vmem:[%s3340_s0 + $0x10] sm:$0xff]  ;;  %v445_v12 = vld [vmem:[#allocation5 + $0xf8] sm:$0xff]  ;;  %v2880_v13 = vpack.c.bf16 %v436_v5, %v432_v4 }
  0x45   :  { %v438_v14 = vld [vmem:[#allocation5 + $0xc0] sm:$0xff]  ;;  %v2884_v16 = vpack.c.bf16 %v443_v8, %v439_v7  ;;  %v440_v17 = vld [vmem:[#allocation5 + $0xd0] sm:$0xff]  ;;  %v2887_v19 = vpack.c.bf16 %v445_v12, %v441_v11  ;;  %v447_v20 = vld [vmem:[#allocation5 + $0x108] sm:$0xff] }
  0x46   :  { %2002 = vmatpush1.bf16.msra.mxu0 %v2001_v36  ;;  %v442_v15 = vld [vmem:[#allocation5 + $0xe0] sm:$0xff]  ;;  %v444_v18 = vld [vmem:[#allocation5 + $0xf0] sm:$0xff]  ;;  %v451_v21 = vld [vmem:[#allocation5 + $0x128] sm:$0xff] }
  0x47   :  { %2034 = vmatpush1.bf16.msra.mxu1 %v2033_v37  ;;  %2036 = vmatprep.subr.bf16.mxu0 %v2838_v38  ;;  %v54_v22 = vld [vmem:[%s3340_s0 + $0x18] sm:$0xff]  ;;  %v2893_v23 = vpack.c.bf16 %v442_v15, %v438_v14  ;;  %v2897_v26 = vpack.c.bf16 %v444_v18, %v440_v17  ;;  %v446_v27 = vld [vmem:[#allocation5 + $0x100] sm:$0xff]  ;;  %v2901_v29 = vpack.c.bf16 %v451_v21, %v447_v20  ;;  %v448_v30 = vld [vmem:[#allocation5 + $0x110] sm:$0xff] }
  0x48   :  { %2068 = vmatprep.subr.bf16.mxu1 %v2840_v41  ;;  %v449_v24 = vld [vmem:[#allocation5 + $0x118] sm:$0xff]  ;;  %v450_v28 = vld [vmem:[#allocation5 + $0x120] sm:$0xff]  ;;  %v452_v31 = vld [vmem:[#allocation5 + $0x130] sm:$0xff] }
  0x49   :  { %210 = vmatmul.mubr.f32.vlgmr.msra.gmra.mrb[0].mxu0 %v51_v46  ;;  %v453_v25 = vld [vmem:[#allocation5 + $0x138] sm:$0xff]  ;;  %v455_v33 = vld [vmem:[#allocation5 + $0x148] sm:$0xff]  ;;  %v55_v35 = vld [vmem:[%s3340_s0 + $0x20] sm:$0xff]  ;;  %v2910_v36 = vpack.c.bf16 %v450_v28, %v446_v27  ;;  %v2914_v40 = vpack.c.bf16 %v452_v31, %v448_v30  ;;  %v125_v28 = vlaneseq }
  0x4a   :  { %323 = vmatmul.mubr.f32.vlgmr.msra.gmra.mrb[0].mxu1 %v51_v46  ;;  %2038 = vmatpush1.bf16.msra.mxu0 %v2845_v47  ;;  %v2904_v32 = vpack.c.bf16 %v453_v25, %v449_v24  ;;  %v459_v34 = vld [vmem:[#allocation5 + $0x168] sm:$0xff]  ;;  %v457_v37 = vld [vmem:[#allocation5 + $0x158] sm:$0xff]  ;;  %v454_v42 = vld [vmem:[#allocation5 + $0x140] sm:$0xff] }
  0x4b   :  { %2070 = vmatpush1.bf16.msra.mxu1 %v2848_v50  ;;  %215 = vmatprep.mubr.f32.mxu0 %v2774_v0  ;;  %v461_v39 = vld [vmem:[#allocation5 + $0x178] sm:$0xff]  ;;  %v458_v43 = vld [vmem:[#allocation5 + $0x160] sm:$0xff]  ;;  %v2918_v44 = vpack.c.bf16 %v459_v34, %v455_v33  ;;  %v456_v45 = vld [vmem:[#allocation5 + $0x150] sm:$0xff]  ;;  %v126_v30 = vshrl.u32 %v125_v28, 7 }
  0x4c   :  { %328 = vmatprep.mubr.f32.mxu1 %v2774_v0  ;;  %2040 = vmatprep.subr.bf16.mxu0 %v2851_v53  ;;  %v460_v46 = vld [vmem:[#allocation5 + $0x170] sm:$0xff]  ;;  %v2921_v48 = vpack.c.bf16 %v461_v39, %v457_v37  ;;  %v463_v49 = vld [vmem:[#allocation5 + $0x188] sm:$0xff]  ;;  %v2927_v54 = vpack.c.bf16 %v458_v43, %v454_v42  ;;  %v465_v55 = vld [vmem:[#allocation5 + $0x198] sm:$0xff] }
  0x4d   :  { %216 = vmatmul.mubr.f32.gmra.mrb[2].mxu0 %v52_v59  ;;  %2072 = vmatprep.subr.bf16.mxu1 %v2853_v56  ;;  %v467_v51 = vld [vmem:[#allocation5 + $0x1a8] sm:$0xff]  ;;  %v469_v57 = vld [vmem:[#allocation5 + $0x1b8] sm:$0xff]  ;;  %v2931_v58 = vpack.c.bf16 %v460_v46, %v456_v45  ;;  %v466_v61 = vld [vmem:[#allocation5 + $0x1a0] sm:$0xff]  ;;  %v127_v31 = vsub.s32 0, %v126_v30  ;;  %v131_v34 = vsub.s32 1, %v126_v30  ;;  %v135_v37 = vsub.s32 2, %v126_v30 }
  0x4e   :  { %329 = vmatmul.mubr.f32.gmra.mrb[2].mxu1 %v52_v59  ;;  %2042 = vmatpush1.bf16.msra.mxu0 %v2859_v60  ;;  %v56_v52 = vld [vmem:[%s3340_s0 + $0x28] sm:$0xff]  ;;  %v462_v59 = vld [vmem:[#allocation5 + $0x180] sm:$0xff]  ;;  %v2935_v62 = vpack.c.bf16 %v467_v51, %v463_v49  ;;  %v464_v1 = vld [vmem:[#allocation5 + $0x190] sm:$0xff]  ;;  %v2938_v4 = vpack.c.bf16 %v469_v57, %v465_v55  ;;  %v139_v51 = vsub.s32 3, %v126_v30 }
  0x4f   :  { %2074 = vmatpush1.bf16.msra.mxu1 %v2863_v63  ;;  %221 = vmatprep.mubr.f32.mxu0 %v2774_v0  ;;  %v468_v2 = vld [vmem:[#allocation5 + $0x1b0] sm:$0xff]  ;;  %v471_v5 = vld [vmem:[#allocation5 + $0x1c8] sm:$0xff]  ;;  %v473_v11 = vld [vmem:[#allocation5 + $0x1d8] sm:$0xff] }
  0x50   :  { %334 = vmatprep.mubr.f32.mxu1 %v2774_v0  ;;  %2044 = vmatprep.subr.bf16.mxu0 %v2867_v3  ;;  %v475_v7 = vld [vmem:[#allocation5 + $0x1e8] sm:$0xff]  ;;  %v57_v8 = vld [vmem:[%s3340_s0 + $0x30] sm:$0xff]  ;;  %v477_v12 = vld [vmem:[#allocation5 + $0x1f8] sm:$0xff]  ;;  %v2948_v14 = vpack.c.bf16 %v468_v2, %v464_v1 }
  0x51   :  { %222 = vmatmul.mubr.f32.gmra.mrb[4].mxu0 %v53_v9  ;;  %2076 = vmatprep.subr.bf16.mxu1 %v2870_v6  ;;  %v470_v15 = vld [vmem:[#allocation5 + $0x1c0] sm:$0xff]  ;;  %v2952_v18 = vpack.c.bf16 %v475_v7, %v471_v5  ;;  %v472_v20 = vld [vmem:[#allocation5 + $0x1d0] sm:$0xff]  ;;  %v58_v24 = vld [vmem:[%s3340_s0 + $0x38] sm:$0xff] }
  0x52   :  { %335 = vmatmul.mubr.f32.gmra.mrb[4].mxu1 %v53_v9  ;;  %2046 = vmatpush1.bf16.msra.mxu0 %v2876_v10  ;;  %v2944_v9 = vpack.c.bf16 %v466_v61, %v462_v59  ;;  %v474_v17 = vld [vmem:[#allocation5 + $0x1e0] sm:$0xff]  ;;  %v476_v21 = vld [vmem:[#allocation5 + $0x1f0] sm:$0xff] }
  0x53   :  { %2078 = vmatpush1.bf16.msra.mxu1 %v2880_v13  ;;  %227 = vmatprep.mubr.f32.mxu0 %v2774_v0  ;;  %v2961_v25 = vpack.c.bf16 %v474_v17, %v470_v15  ;;  %v2965_v27 = vpack.c.bf16 %v476_v21, %v472_v20  ;;  %v123_v33 = vld [vmem:[%s3343_s3] sm:$0xf] }
  0x54   :  { %340 = vmatprep.mubr.f32.mxu1 %v2774_v0  ;;  %2048 = vmatprep.subr.bf16.mxu0 %v2884_v16  ;;  %v3017_v39 = vrot.slane %v123_v33, %v131_v34  ;;  %v3020_v45 = vrot.slane %v123_v33, %v135_v37  ;;  %v3024_v1 = vrot.slane %v123_v33, %v139_v51 }
  0x55   :  { %228 = vmatmul.mubr.f32.gmra.mrb[6].mxu0 %v54_v22  ;;  %2080 = vmatprep.subr.bf16.mxu1 %v2887_v19 }
  0x56   :  { %341 = vmatmul.mubr.f32.gmra.mrb[6].mxu1 %v54_v22  ;;  %2050 = vmatpush1.bf16.msra.mxu0 %v2893_v23  ;;  %v2955_v22 = vpack.c.bf16 %v477_v12, %v473_v11 }
  0x57   :  { %2082 = vmatpush1.bf16.msra.mxu1 %v2897_v26  ;;  %233 = vmatprep.mubr.f32.mxu0 %v2774_v0 }
  0x58   :  { %346 = vmatprep.mubr.f32.mxu1 %v2774_v0  ;;  %2052 = vmatprep.subr.bf16.mxu0 %v2901_v29 }
  0x59   :  { %234 = vmatmul.mubr.f32.gmra.mrb[8].mxu0 %v55_v35  ;;  %2084 = vmatprep.subr.bf16.mxu1 %v2904_v32 }
  0x5a   :  { %347 = vmatmul.mubr.f32.gmra.mrb[8].mxu1 %v55_v35  ;;  %2054 = vmatpush1.bf16.msra.mxu0 %v2910_v36  ;;  %v3015_v35 = vrot.slane %v123_v33, %v127_v31 }
  0x5b   :  { %2086 = vmatpush1.bf16.msra.mxu1 %v2914_v40  ;;  %239 = vmatprep.mubr.f32.mxu0 %v2774_v0 }
  0x5c   :  { %352 = vmatprep.mubr.f32.mxu1 %v2774_v0  ;;  %2056 = vmatprep.subr.bf16.mxu0 %v2918_v44 }
  0x5d   :  { %240 = vmatmul.mubr.f32.gmra.mrb[10].mxu0 %v56_v52  ;;  %2088 = vmatprep.subr.bf16.mxu1 %v2921_v48 }
  0x5e   :  { %353 = vmatmul.mubr.f32.gmra.mrb[10].mxu1 %v56_v52  ;;  %2058 = vmatpush1.bf16.msra.mxu0 %v2927_v54 }
  0x5f   :  { %2090 = vmatpush1.bf16.msra.mxu1 %v2931_v58  ;;  %245 = vmatprep.mubr.f32.mxu0 %v2774_v0 }
  0x60   :  { %358 = vmatprep.mubr.f32.mxu1 %v2774_v0  ;;  %2060 = vmatprep.subr.bf16.mxu0 %v2935_v62 }
  0x61   :  { %246 = vmatmul.mubr.f32.gmra.mrb[12].mxu0 %v57_v8  ;;  %2092 = vmatprep.subr.bf16.mxu1 %v2938_v4 }
  0x62   :  { %359 = vmatmul.mubr.f32.gmra.mrb[12].mxu1 %v57_v8  ;;  %2062 = vmatpush1.bf16.msra.mxu0 %v2944_v9 }
  0x63   :  { %2094 = vmatpush1.bf16.msra.mxu1 %v2948_v14  ;;  %251 = vmatprep.mubr.f32.mxu0 %v2774_v0 }
  0x64   :  { %364 = vmatprep.mubr.f32.mxu1 %v2774_v0  ;;  %2064 = vmatprep.subr.bf16.mxu0 %v2952_v18 }
  0x65   :  { %252 = vmatmul.mubr.f32.gmra.mrb[14].mxu0 %v58_v24  ;;  %2096 = vmatprep.subr.bf16.mxu1 %v2955_v22 }
  0x66   :  { %365 = vmatmul.mubr.f32.gmra.mrb[14].mxu1 %v58_v24  ;;  %2066 = vmatpush1.bf16.msra.mxu0 %v2961_v25 }
  0x67   :  { %2098 = vmatpush1.bf16.msra.mxu1 %v2965_v27  ;;  %542 = vmatprep.mubr.f32.mxu0 %v2774_v0 }
  0x68   :  { %613 = vmatprep.mubr.f32.mxu1 %v2774_v0  ;;  %2100 = vmatprep.subr.bf16.mxu0 %v2838_v38 }
  0x69   :  { %543 = vmatmul.mubr.f32.vlgmr.msra.gmra.mrb[0].mxu0 %v2774_v0  ;;  %2132 = vmatprep.subr.bf16.mxu1 %v2840_v41 }
  0x6a   :  { %614 = vmatmul.mubr.f32.vlgmr.msra.gmra.mrb[0].mxu1 %v2774_v0  ;;  %2102 = vmatpush1.bf16.msra.mxu0 %v2845_v47 }
  0x6b   :  { %2134 = vmatpush1.bf16.msra.mxu1 %v2848_v50  ;;  %2104 = vmatprep.subr.bf16.mxu0 %v2851_v53 }
  0x6c   :  { %2136 = vmatprep.subr.bf16.mxu1 %v2853_v56  ;;  %710 = vmatprep.mubr.f32.mxu0 %v2774_v0 }
  0x6d   :  { %781 = vmatprep.mubr.f32.mxu1 %v2774_v0 }
  0x6e   :  { %2106 = vmatpush1.bf16.msra.mxu0 %v2859_v60 }
  0x6f   :  { %2138 = vmatpush1.bf16.msra.mxu1 %v2863_v63  ;;  %2108 = vmatprep.subr.bf16.mxu0 %v2867_v3 }
  0x70   :  { %2140 = vmatprep.subr.bf16.mxu1 %v2870_v6 }
  0x72   :  { %2110 = vmatpush1.bf16.msra.mxu0 %v2876_v10 }
  0x73   :  { %2142 = vmatpush1.bf16.msra.mxu1 %v2880_v13  ;;  %2112 = vmatprep.subr.bf16.mxu0 %v2884_v16 }
  0x74   :  { %2144 = vmatprep.subr.bf16.mxu1 %v2887_v19 }
  0x76   :  { %2114 = vmatpush1.bf16.msra.mxu0 %v2893_v23 }
  0x77   :  { %2146 = vmatpush1.bf16.msra.mxu1 %v2897_v26  ;;  %2116 = vmatprep.subr.bf16.mxu0 %v2901_v29 }
  0x78   :  { %2148 = vmatprep.subr.bf16.mxu1 %v2904_v32 }
  0x7a   :  { %2118 = vmatpush1.bf16.msra.mxu0 %v2910_v36 }
  0x7b   :  { %2150 = vmatpush1.bf16.msra.mxu1 %v2914_v40  ;;  %2120 = vmatprep.subr.bf16.mxu0 %v2918_v44 }
  0x7c   :  { %2152 = vmatprep.subr.bf16.mxu1 %v2921_v48 }
  0x7e   :  { %2122 = vmatpush1.bf16.msra.mxu0 %v2927_v54 }
  0x7f   :  { %2154 = vmatpush1.bf16.msra.mxu1 %v2931_v58  ;;  %2124 = vmatprep.subr.bf16.mxu0 %v2935_v62 }
  0x80   :  { %2156 = vmatprep.subr.bf16.mxu1 %v2938_v4 }
  0x82   :  { %2126 = vmatpush1.bf16.msra.mxu0 %v2944_v9 }
  0x83   :  { %2158 = vmatpush1.bf16.msra.mxu1 %v2948_v14  ;;  %2128 = vmatprep.subr.bf16.mxu0 %v2952_v18 }
  0x84   :  { %2160 = vmatprep.subr.bf16.mxu1 %v2955_v22 }
  0x86   :  { %2130 = vmatpush1.bf16.msra.mxu0 %v2961_v25 }
  0x87   :  { %2162 = vmatpush1.bf16.msra.mxu1 %v2965_v27  ;;  %2164 = vmatprep.subr.bf16.mxu0 %v2838_v38 }
  0x88   :  { %2196 = vmatprep.subr.bf16.mxu1 %v2840_v41 }
 0x13c   :  { %v544_v42 = vpop.f32.mrb[0].mxu0 }
 0x13d   :  { %v2571_v43 = vadd.f32 %v544_v42, %v3015_v35  ;;  %v615_v46 = vpop.f32.mrb[0].mxu1  ;;  %v546_v49 = vpop.f32.mrb[1].mxu0 }
 0x13e   :  { %v2572_v52 = vadd.f32 %v546_v49, %v3017_v39  ;;  %v617_v55 = vpop.f32.mrb[1].mxu1  ;;  %v2587_v61 = vadd.f32 %v615_v46, %v3020_v45 }
 0x13f   :  { %v624_v57 = vmul.f32 0.5, %v2571_v43  ;;  %v2588_v2 = vadd.f32 %v617_v55, %v3024_v1 }
 0x140   :  { %v628_v59 = vmul.f32 0.5, %v2572_v52 }
 0x141   :  { %2642 = vtanh.f32 %v624_v57  ;;  %v633_v5 = vmul.f32 0.5, %v2588_v2 }
 0x142   :  { %2644 = vtanh.f32 %v628_v59 }
 0x143   :  { %2646 = vtanh.f32 %v2587_v61 }
 0x144   :  { %2648 = vtanh.f32 %v633_v5 }
 0x14b   :  { %v2643_v7 = vpop.eup %2642 }
 0x14c   :  { %v2645_v8 = vpop.eup %2644  ;;  %v626_v11 = vmul.f32 0.5, %v2643_v7 }
 0x14d   :  { %v630_v12 = vmul.f32 0.5, %v2645_v8  ;;  %v2647_v17 = vpop.eup %2646 }
 0x14e   :  { %v627_v15 = vadd.f32 0.5, %v626_v11  ;;  %v2649_v30 = vpop.eup %2648 }
 0x14f   :  { %v631_v20 = vadd.f32 0.5, %v630_v12  ;;  %v635_v31 = vmul.f32 0.5, %v2649_v30 }
 0x150   :  { %v638_v21 = vmul.f32 %v2647_v17, %v627_v15 }
 0x151   :  { %v637_v24 = vmul.f32 0.0, %v631_v20  ;;  %v636_v33 = vadd.f32 0.5, %v635_v31 }
 0x153   :  { %v3027_v28 = vadd.f32 %v638_v21, %v637_v24 }
 0x155   :  { %2650 = vtanh.f32 %v3027_v28 }
 0x15f   :  { %v2651_v34 = vpop.eup %2650 }
 0x160   :  { %v641_v37 = vmul.f32 %v2651_v34, %v636_v33 }
 0x162   :  { %711 = vmatmul.mubr.f32.vlgmr.msra.gmra.mrb[2].mxu0 %v641_v37  ;;  %782 = vmatmul.mubr.f32.vlgmr.msra.gmra.mrb[2].mxu1 %v641_v37 }
 0x163   :  { %2166 = vmatpush1.bf16.msra.mxu0 %v2845_v47  ;;  %2198 = vmatpush1.bf16.msra.mxu1 %v2848_v50 }
 0x164   :  { %2168 = vmatprep.subr.bf16.mxu0 %v2851_v53  ;;  %2200 = vmatprep.subr.bf16.mxu1 %v2853_v56 }
 0x165   :  { %878 = vmatprep.mubr.f32.mxu0 %v2774_v0  ;;  %949 = vmatprep.mubr.f32.mxu1 %v2774_v0 }
 0x167   :  { %2170 = vmatpush1.bf16.msra.mxu0 %v2859_v60  ;;  %2202 = vmatpush1.bf16.msra.mxu1 %v2863_v63 }
 0x168   :  { %2172 = vmatprep.subr.bf16.mxu0 %v2867_v3  ;;  %2204 = vmatprep.subr.bf16.mxu1 %v2870_v6 }
 0x16b   :  { %2174 = vmatpush1.bf16.msra.mxu0 %v2876_v10  ;;  %2206 = vmatpush1.bf16.msra.mxu1 %v2880_v13 }
 0x16c   :  { %2176 = vmatprep.subr.bf16.mxu0 %v2884_v16  ;;  %2208 = vmatprep.subr.bf16.mxu1 %v2887_v19 }
 0x16f   :  { %2178 = vmatpush1.bf16.msra.mxu0 %v2893_v23  ;;  %2210 = vmatpush1.bf16.msra.mxu1 %v2897_v26 }
 0x170   :  { %2180 = vmatprep.subr.bf16.mxu0 %v2901_v29  ;;  %2212 = vmatprep.subr.bf16.mxu1 %v2904_v32 }
 0x173   :  { %2182 = vmatpush1.bf16.msra.mxu0 %v2910_v36  ;;  %2214 = vmatpush1.bf16.msra.mxu1 %v2914_v40 }
 0x174   :  { %2184 = vmatprep.subr.bf16.mxu0 %v2918_v44  ;;  %2216 = vmatprep.subr.bf16.mxu1 %v2921_v48 }
 0x177   :  { %2186 = vmatpush1.bf16.msra.mxu0 %v2927_v54  ;;  %2218 = vmatpush1.bf16.msra.mxu1 %v2931_v58 }
 0x178   :  { %2188 = vmatprep.subr.bf16.mxu0 %v2935_v62  ;;  %2220 = vmatprep.subr.bf16.mxu1 %v2938_v4 }
 0x17b   :  { %2190 = vmatpush1.bf16.msra.mxu0 %v2944_v9  ;;  %2222 = vmatpush1.bf16.msra.mxu1 %v2948_v14 }
 0x17c   :  { %2192 = vmatprep.subr.bf16.mxu0 %v2952_v18  ;;  %2224 = vmatprep.subr.bf16.mxu1 %v2955_v22 }
 0x17f   :  { %2194 = vmatpush1.bf16.msra.mxu0 %v2961_v25  ;;  %2226 = vmatpush1.bf16.msra.mxu1 %v2965_v27 }
 0x180   :  { %2228 = vmatprep.subr.bf16.mxu0 %v2838_v38  ;;  %2260 = vmatprep.subr.bf16.mxu1 %v2840_v41 }
 0x235   :  { %v712_v42 = vpop.f32.mrb[2].mxu0  ;;  %v783_v43 = vpop.f32.mrb[2].mxu1 }
 0x236   :  { %v2573_v46 = vadd.f32 %v712_v42, %v3015_v35  ;;  %v714_v49 = vpop.f32.mrb[3].mxu0  ;;  %v785_v51 = vpop.f32.mrb[3].mxu1  ;;  %v2589_v59 = vadd.f32 %v783_v43, %v3020_v45 }
 0x237   :  { %v2574_v52 = vadd.f32 %v714_v49, %v3017_v39  ;;  %v2590_v61 = vadd.f32 %v785_v51, %v3024_v1 }
 0x238   :  { %v792_v55 = vmul.f32 0.5, %v2573_v46 }
 0x239   :  { %v796_v57 = vmul.f32 0.5, %v2574_v52  ;;  %v801_v2 = vmul.f32 0.5, %v2590_v61 }
 0x23a   :  { %2652 = vtanh.f32 %v792_v55 }
 0x23b   :  { %2654 = vtanh.f32 %v796_v57 }
 0x23c   :  { %2656 = vtanh.f32 %v2589_v59 }
 0x23d   :  { %2658 = vtanh.f32 %v801_v2 }
 0x244   :  { %v2653_v5 = vpop.eup %2652 }
 0x245   :  { %v2655_v7 = vpop.eup %2654  ;;  %v794_v8 = vmul.f32 0.5, %v2653_v5 }
 0x246   :  { %v798_v11 = vmul.f32 0.5, %v2655_v7  ;;  %v2657_v15 = vpop.eup %2656 }
 0x247   :  { %v795_v12 = vadd.f32 0.5, %v794_v8  ;;  %v2659_v30 = vpop.eup %2658 }
 0x248   :  { %v799_v17 = vadd.f32 0.5, %v798_v11  ;;  %v803_v31 = vmul.f32 0.5, %v2659_v30 }
 0x249   :  { %v806_v20 = vmul.f32 %v2657_v15, %v795_v12 }
 0x24a   :  { %v805_v21 = vmul.f32 %v799_v17, %v3027_v28  ;;  %v804_v33 = vadd.f32 0.5, %v803_v31 }
 0x24c   :  { %v3069_v24 = vadd.f32 %v806_v20, %v805_v21 }
 0x24e   :  { %2660 = vtanh.f32 %v3069_v24 }
 0x258   :  { %v2661_v34 = vpop.eup %2660 }
 0x259   :  { %v809_v37 = vmul.f32 %v2661_v34, %v804_v33 }
 0x25b   :  { %879 = vmatmul.mubr.f32.vlgmr.msra.gmra.mrb[4].mxu0 %v809_v37  ;;  %950 = vmatmul.mubr.f32.vlgmr.msra.gmra.mrb[4].mxu1 %v809_v37 }
 0x25c   :  { %2230 = vmatpush1.bf16.msra.mxu0 %v2845_v47  ;;  %2262 = vmatpush1.bf16.msra.mxu1 %v2848_v50 }
 0x25d   :  { %2232 = vmatprep.subr.bf16.mxu0 %v2851_v53  ;;  %2264 = vmatprep.subr.bf16.mxu1 %v2853_v56 }
 0x25e   :  { %1046 = vmatprep.mubr.f32.mxu0 %v2774_v0  ;;  %1117 = vmatprep.mubr.f32.mxu1 %v2774_v0 }
 0x260   :  { %2234 = vmatpush1.bf16.msra.mxu0 %v2859_v60  ;;  %2266 = vmatpush1.bf16.msra.mxu1 %v2863_v63 }
 0x261   :  { %2236 = vmatprep.subr.bf16.mxu0 %v2867_v3  ;;  %2268 = vmatprep.subr.bf16.mxu1 %v2870_v6 }
 0x264   :  { %2238 = vmatpush1.bf16.msra.mxu0 %v2876_v10  ;;  %2270 = vmatpush1.bf16.msra.mxu1 %v2880_v13 }
 0x265   :  { %2240 = vmatprep.subr.bf16.mxu0 %v2884_v16  ;;  %2272 = vmatprep.subr.bf16.mxu1 %v2887_v19 }
 0x268   :  { %2242 = vmatpush1.bf16.msra.mxu0 %v2893_v23  ;;  %2274 = vmatpush1.bf16.msra.mxu1 %v2897_v26 }
 0x269   :  { %2244 = vmatprep.subr.bf16.mxu0 %v2901_v29  ;;  %2276 = vmatprep.subr.bf16.mxu1 %v2904_v32 }
 0x26c   :  { %2246 = vmatpush1.bf16.msra.mxu0 %v2910_v36  ;;  %2278 = vmatpush1.bf16.msra.mxu1 %v2914_v40 }
 0x26d   :  { %2248 = vmatprep.subr.bf16.mxu0 %v2918_v44  ;;  %2280 = vmatprep.subr.bf16.mxu1 %v2921_v48 }
 0x270   :  { %2250 = vmatpush1.bf16.msra.mxu0 %v2927_v54  ;;  %2282 = vmatpush1.bf16.msra.mxu1 %v2931_v58 }
 0x271   :  { %2252 = vmatprep.subr.bf16.mxu0 %v2935_v62  ;;  %2284 = vmatprep.subr.bf16.mxu1 %v2938_v4 }
 0x274   :  { %2254 = vmatpush1.bf16.msra.mxu0 %v2944_v9  ;;  %2286 = vmatpush1.bf16.msra.mxu1 %v2948_v14 }
 0x275   :  { %2256 = vmatprep.subr.bf16.mxu0 %v2952_v18  ;;  %2288 = vmatprep.subr.bf16.mxu1 %v2955_v22 }
 0x278   :  { %2258 = vmatpush1.bf16.msra.mxu0 %v2961_v25  ;;  %2290 = vmatpush1.bf16.msra.mxu1 %v2965_v27 }
 0x279   :  { %2292 = vmatprep.subr.bf16.mxu0 %v2838_v38  ;;  %2324 = vmatprep.subr.bf16.mxu1 %v2840_v41 }
 0x32e   :  { %v880_v28 = vpop.f32.mrb[4].mxu0  ;;  %v951_v42 = vpop.f32.mrb[4].mxu1 }
 0x32f   :  { %v2575_v43 = vadd.f32 %v880_v28, %v3015_v35  ;;  %v882_v46 = vpop.f32.mrb[5].mxu0  ;;  %v953_v49 = vpop.f32.mrb[5].mxu1  ;;  %v2591_v57 = vadd.f32 %v951_v42, %v3020_v45 }
 0x330   :  { %v2576_v51 = vadd.f32 %v882_v46, %v3017_v39  ;;  %v2592_v59 = vadd.f32 %v953_v49, %v3024_v1 }
 0x331   :  { %v960_v52 = vmul.f32 0.5, %v2575_v43 }
 0x332   :  { %v964_v55 = vmul.f32 0.5, %v2576_v51  ;;  %v969_v61 = vmul.f32 0.5, %v2592_v59 }
 0x333   :  { %2662 = vtanh.f32 %v960_v52 }
 0x334   :  { %2664 = vtanh.f32 %v964_v55 }
 0x335   :  { %2666 = vtanh.f32 %v2591_v57 }
 0x336   :  { %2668 = vtanh.f32 %v969_v61 }
 0x33d   :  { %v2663_v2 = vpop.eup %2662 }
 0x33e   :  { %v2665_v5 = vpop.eup %2664  ;;  %v962_v7 = vmul.f32 0.5, %v2663_v2 }
 0x33f   :  { %v966_v8 = vmul.f32 0.5, %v2665_v5  ;;  %v2667_v12 = vpop.eup %2666 }
 0x340   :  { %v963_v11 = vadd.f32 0.5, %v962_v7  ;;  %v2669_v30 = vpop.eup %2668 }
 0x341   :  { %v967_v15 = vadd.f32 0.5, %v966_v8  ;;  %v971_v31 = vmul.f32 0.5, %v2669_v30 }
 0x342   :  { %v974_v17 = vmul.f32 %v2667_v12, %v963_v11 }
 0x343   :  { %v973_v20 = vmul.f32 %v967_v15, %v3069_v24  ;;  %v972_v33 = vadd.f32 0.5, %v971_v31 }
 0x345   :  { %v3111_v21 = vadd.f32 %v974_v17, %v973_v20 }
 0x347   :  { %2670 = vtanh.f32 %v3111_v21 }
 0x351   :  { %v2671_v34 = vpop.eup %2670 }
 0x352   :  { %v977_v37 = vmul.f32 %v2671_v34, %v972_v33 }
 0x354   :  { %1047 = vmatmul.mubr.f32.vlgmr.msra.gmra.mrb[6].mxu0 %v977_v37  ;;  %1118 = vmatmul.mubr.f32.vlgmr.msra.gmra.mrb[6].mxu1 %v977_v37 }
 0x355   :  { %2294 = vmatpush1.bf16.msra.mxu0 %v2845_v47  ;;  %2326 = vmatpush1.bf16.msra.mxu1 %v2848_v50 }
 0x356   :  { %2296 = vmatprep.subr.bf16.mxu0 %v2851_v53  ;;  %2328 = vmatprep.subr.bf16.mxu1 %v2853_v56 }
 0x357   :  { %1214 = vmatprep.mubr.f32.mxu0 %v2774_v0  ;;  %1285 = vmatprep.mubr.f32.mxu1 %v2774_v0 }
 0x359   :  { %2298 = vmatpush1.bf16.msra.mxu0 %v2859_v60  ;;  %2330 = vmatpush1.bf16.msra.mxu1 %v2863_v63 }
 0x35a   :  { %2300 = vmatprep.subr.bf16.mxu0 %v2867_v3  ;;  %2332 = vmatprep.subr.bf16.mxu1 %v2870_v6 }
 0x35d   :  { %2302 = vmatpush1.bf16.msra.mxu0 %v2876_v10  ;;  %2334 = vmatpush1.bf16.msra.mxu1 %v2880_v13 }
 0x35e   :  { %2304 = vmatprep.subr.bf16.mxu0 %v2884_v16  ;;  %2336 = vmatprep.subr.bf16.mxu1 %v2887_v19 }
 0x361   :  { %2306 = vmatpush1.bf16.msra.mxu0 %v2893_v23  ;;  %2338 = vmatpush1.bf16.msra.mxu1 %v2897_v26 }
 0x362   :  { %2308 = vmatprep.subr.bf16.mxu0 %v2901_v29  ;;  %2340 = vmatprep.subr.bf16.mxu1 %v2904_v32 }
 0x365   :  { %2310 = vmatpush1.bf16.msra.mxu0 %v2910_v36  ;;  %2342 = vmatpush1.bf16.msra.mxu1 %v2914_v40 }
 0x366   :  { %2312 = vmatprep.subr.bf16.mxu0 %v2918_v44  ;;  %2344 = vmatprep.subr.bf16.mxu1 %v2921_v48 }
 0x369   :  { %2314 = vmatpush1.bf16.msra.mxu0 %v2927_v54  ;;  %2346 = vmatpush1.bf16.msra.mxu1 %v2931_v58 }
 0x36a   :  { %2316 = vmatprep.subr.bf16.mxu0 %v2935_v62  ;;  %2348 = vmatprep.subr.bf16.mxu1 %v2938_v4 }
 0x36d   :  { %2318 = vmatpush1.bf16.msra.mxu0 %v2944_v9  ;;  %2350 = vmatpush1.bf16.msra.mxu1 %v2948_v14 }
 0x36e   :  { %2320 = vmatprep.subr.bf16.mxu0 %v2952_v18  ;;  %2352 = vmatprep.subr.bf16.mxu1 %v2955_v22 }
 0x371   :  { %2322 = vmatpush1.bf16.msra.mxu0 %v2961_v25  ;;  %2354 = vmatpush1.bf16.msra.mxu1 %v2965_v27 }
 0x372   :  { %2356 = vmatprep.subr.bf16.mxu0 %v2838_v38  ;;  %2388 = vmatprep.subr.bf16.mxu1 %v2840_v41 }
 0x427   :  { %v1048_v24 = vpop.f32.mrb[6].mxu0  ;;  %v1119_v28 = vpop.f32.mrb[6].mxu1 }
 0x428   :  { %v2577_v42 = vadd.f32 %v1048_v24, %v3015_v35  ;;  %v1050_v43 = vpop.f32.mrb[7].mxu0  ;;  %v1121_v46 = vpop.f32.mrb[7].mxu1  ;;  %v2593_v55 = vadd.f32 %v1119_v28, %v3020_v45 }
 0x429   :  { %v2578_v49 = vadd.f32 %v1050_v43, %v3017_v39  ;;  %v2594_v57 = vadd.f32 %v1121_v46, %v3024_v1 }
 0x42a   :  { %v1128_v51 = vmul.f32 0.5, %v2577_v42 }
 0x42b   :  { %v1132_v52 = vmul.f32 0.5, %v2578_v49  ;;  %v1137_v59 = vmul.f32 0.5, %v2594_v57 }
 0x42c   :  { %2672 = vtanh.f32 %v1128_v51 }
 0x42d   :  { %2674 = vtanh.f32 %v1132_v52 }
 0x42e   :  { %2676 = vtanh.f32 %v2593_v55 }
 0x42f   :  { %2678 = vtanh.f32 %v1137_v59 }
 0x436   :  { %v2673_v61 = vpop.eup %2672 }
 0x437   :  { %v2675_v2 = vpop.eup %2674  ;;  %v1130_v5 = vmul.f32 0.5, %v2673_v61 }
 0x438   :  { %v1134_v7 = vmul.f32 0.5, %v2675_v2  ;;  %v2677_v11 = vpop.eup %2676 }
 0x439   :  { %v1131_v8 = vadd.f32 0.5, %v1130_v5  ;;  %v2679_v30 = vpop.eup %2678 }
 0x43a   :  { %v1135_v12 = vadd.f32 0.5, %v1134_v7  ;;  %v1139_v31 = vmul.f32 0.5, %v2679_v30 }
 0x43b   :  { %v1142_v15 = vmul.f32 %v2677_v11, %v1131_v8 }
 0x43c   :  { %v1141_v17 = vmul.f32 %v1135_v12, %v3111_v21  ;;  %v1140_v33 = vadd.f32 0.5, %v1139_v31 }
 0x43e   :  { %v3153_v20 = vadd.f32 %v1142_v15, %v1141_v17 }
 0x440   :  { %2680 = vtanh.f32 %v3153_v20 }
 0x44a   :  { %v2681_v34 = vpop.eup %2680 }
 0x44b   :  { %v1145_v37 = vmul.f32 %v2681_v34, %v1140_v33 }
 0x44d   :  { %1215 = vmatmul.mubr.f32.vlgmr.msra.gmra.mrb[8].mxu0 %v1145_v37  ;;  %1286 = vmatmul.mubr.f32.vlgmr.msra.gmra.mrb[8].mxu1 %v1145_v37 }
 0x44e   :  { %2358 = vmatpush1.bf16.msra.mxu0 %v2845_v47  ;;  %2390 = vmatpush1.bf16.msra.mxu1 %v2848_v50 }
 0x44f   :  { %2360 = vmatprep.subr.bf16.mxu0 %v2851_v53  ;;  %2392 = vmatprep.subr.bf16.mxu1 %v2853_v56 }
 0x450   :  { %1382 = vmatprep.mubr.f32.mxu0 %v2774_v0  ;;  %1453 = vmatprep.mubr.f32.mxu1 %v2774_v0 }
 0x452   :  { %2362 = vmatpush1.bf16.msra.mxu0 %v2859_v60  ;;  %2394 = vmatpush1.bf16.msra.mxu1 %v2863_v63 }
 0x453   :  { %2364 = vmatprep.subr.bf16.mxu0 %v2867_v3  ;;  %2396 = vmatprep.subr.bf16.mxu1 %v2870_v6 }
 0x456   :  { %2366 = vmatpush1.bf16.msra.mxu0 %v2876_v10  ;;  %2398 = vmatpush1.bf16.msra.mxu1 %v2880_v13 }
 0x457   :  { %2368 = vmatprep.subr.bf16.mxu0 %v2884_v16  ;;  %2400 = vmatprep.subr.bf16.mxu1 %v2887_v19 }
 0x45a   :  { %2370 = vmatpush1.bf16.msra.mxu0 %v2893_v23  ;;  %2402 = vmatpush1.bf16.msra.mxu1 %v2897_v26 }
 0x45b   :  { %2372 = vmatprep.subr.bf16.mxu0 %v2901_v29  ;;  %2404 = vmatprep.subr.bf16.mxu1 %v2904_v32 }
 0x45e   :  { %2374 = vmatpush1.bf16.msra.mxu0 %v2910_v36  ;;  %2406 = vmatpush1.bf16.msra.mxu1 %v2914_v40 }
 0x45f   :  { %2376 = vmatprep.subr.bf16.mxu0 %v2918_v44  ;;  %2408 = vmatprep.subr.bf16.mxu1 %v2921_v48 }
 0x462   :  { %2378 = vmatpush1.bf16.msra.mxu0 %v2927_v54  ;;  %2410 = vmatpush1.bf16.msra.mxu1 %v2931_v58 }
 0x463   :  { %2380 = vmatprep.subr.bf16.mxu0 %v2935_v62  ;;  %2412 = vmatprep.subr.bf16.mxu1 %v2938_v4 }
 0x466   :  { %2382 = vmatpush1.bf16.msra.mxu0 %v2944_v9  ;;  %2414 = vmatpush1.bf16.msra.mxu1 %v2948_v14 }
 0x467   :  { %2384 = vmatprep.subr.bf16.mxu0 %v2952_v18  ;;  %2416 = vmatprep.subr.bf16.mxu1 %v2955_v22 }
 0x46a   :  { %2386 = vmatpush1.bf16.msra.mxu0 %v2961_v25  ;;  %2418 = vmatpush1.bf16.msra.mxu1 %v2965_v27 }
 0x46b   :  { %2420 = vmatprep.subr.bf16.mxu0 %v2838_v38  ;;  %2452 = vmatprep.subr.bf16.mxu1 %v2840_v41 }
 0x520   :  { %v1216_v21 = vpop.f32.mrb[8].mxu0  ;;  %v1287_v24 = vpop.f32.mrb[8].mxu1 }
 0x521   :  { %v2579_v28 = vadd.f32 %v1216_v21, %v3015_v35  ;;  %v1218_v42 = vpop.f32.mrb[9].mxu0  ;;  %v1289_v43 = vpop.f32.mrb[9].mxu1  ;;  %v2595_v52 = vadd.f32 %v1287_v24, %v3020_v45 }
 0x522   :  { %v2580_v46 = vadd.f32 %v1218_v42, %v3017_v39  ;;  %v2596_v55 = vadd.f32 %v1289_v43, %v3024_v1 }
 0x523   :  { %v1296_v49 = vmul.f32 0.5, %v2579_v28 }
 0x524   :  { %v1300_v51 = vmul.f32 0.5, %v2580_v46  ;;  %v1305_v57 = vmul.f32 0.5, %v2596_v55 }
 0x525   :  { %2682 = vtanh.f32 %v1296_v49 }
 0x526   :  { %2684 = vtanh.f32 %v1300_v51 }
 0x527   :  { %2686 = vtanh.f32 %v2595_v52 }
 0x528   :  { %2688 = vtanh.f32 %v1305_v57 }
 0x52f   :  { %v2683_v59 = vpop.eup %2682 }
 0x530   :  { %v2685_v61 = vpop.eup %2684  ;;  %v1298_v2 = vmul.f32 0.5, %v2683_v59 }
 0x531   :  { %v1302_v5 = vmul.f32 0.5, %v2685_v61  ;;  %v2687_v8 = vpop.eup %2686 }
 0x532   :  { %v1299_v7 = vadd.f32 0.5, %v1298_v2  ;;  %v2689_v30 = vpop.eup %2688 }
 0x533   :  { %v1303_v11 = vadd.f32 0.5, %v1302_v5  ;;  %v1307_v31 = vmul.f32 0.5, %v2689_v30 }
 0x534   :  { %v1310_v12 = vmul.f32 %v2687_v8, %v1299_v7 }
 0x535   :  { %v1309_v15 = vmul.f32 %v1303_v11, %v3153_v20  ;;  %v1308_v33 = vadd.f32 0.5, %v1307_v31 }
 0x537   :  { %v3195_v17 = vadd.f32 %v1310_v12, %v1309_v15 }
 0x539   :  { %2690 = vtanh.f32 %v3195_v17 }
 0x543   :  { %v2691_v34 = vpop.eup %2690 }
 0x544   :  { %v1313_v37 = vmul.f32 %v2691_v34, %v1308_v33  ;;  %v1821_v34 = vld [vmem:[%s3344_s4 + $0x18] sm:$0xff] }
 0x546   :  { %1383 = vmatmul.mubr.f32.vlgmr.msra.gmra.mrb[10].mxu0 %v1313_v37  ;;  %1454 = vmatmul.mubr.f32.vlgmr.msra.gmra.mrb[10].mxu1 %v1313_v37 }
 0x547   :  { %2422 = vmatpush1.bf16.msra.mxu0 %v2845_v47  ;;  %2454 = vmatpush1.bf16.msra.mxu1 %v2848_v50 }
 0x548   :  { %2424 = vmatprep.subr.bf16.mxu0 %v2851_v53  ;;  %2456 = vmatprep.subr.bf16.mxu1 %v2853_v56 }
 0x549   :  { %1550 = vmatprep.mubr.f32.mxu0 %v2774_v0  ;;  %1621 = vmatprep.mubr.f32.mxu1 %v2774_v0 }
 0x54b   :  { %2426 = vmatpush1.bf16.msra.mxu0 %v2859_v60  ;;  %2458 = vmatpush1.bf16.msra.mxu1 %v2863_v63 }
 0x54c   :  { %2428 = vmatprep.subr.bf16.mxu0 %v2867_v3  ;;  %2460 = vmatprep.subr.bf16.mxu1 %v2870_v6 }
 0x54f   :  { %2430 = vmatpush1.bf16.msra.mxu0 %v2876_v10  ;;  %2462 = vmatpush1.bf16.msra.mxu1 %v2880_v13 }
 0x550   :  { %2432 = vmatprep.subr.bf16.mxu0 %v2884_v16  ;;  %2464 = vmatprep.subr.bf16.mxu1 %v2887_v19 }
 0x553   :  { %2434 = vmatpush1.bf16.msra.mxu0 %v2893_v23  ;;  %2466 = vmatpush1.bf16.msra.mxu1 %v2897_v26 }
 0x554   :  { %2436 = vmatprep.subr.bf16.mxu0 %v2901_v29  ;;  %2468 = vmatprep.subr.bf16.mxu1 %v2904_v32 }
 0x557   :  { %2438 = vmatpush1.bf16.msra.mxu0 %v2910_v36  ;;  %2470 = vmatpush1.bf16.msra.mxu1 %v2914_v40 }
 0x558   :  { %2440 = vmatprep.subr.bf16.mxu0 %v2918_v44  ;;  %2472 = vmatprep.subr.bf16.mxu1 %v2921_v48 }
 0x55b   :  { %2442 = vmatpush1.bf16.msra.mxu0 %v2927_v54  ;;  %2474 = vmatpush1.bf16.msra.mxu1 %v2931_v58 }
 0x55c   :  { %2444 = vmatprep.subr.bf16.mxu0 %v2935_v62  ;;  %2476 = vmatprep.subr.bf16.mxu1 %v2938_v4 }
 0x55f   :  { %2446 = vmatpush1.bf16.msra.mxu0 %v2944_v9  ;;  %2478 = vmatpush1.bf16.msra.mxu1 %v2948_v14 }
 0x560   :  { %2448 = vmatprep.subr.bf16.mxu0 %v2952_v18  ;;  %2480 = vmatprep.subr.bf16.mxu1 %v2955_v22 }
 0x563   :  { %2450 = vmatpush1.bf16.msra.mxu0 %v2961_v25  ;;  %2482 = vmatpush1.bf16.msra.mxu1 %v2965_v27 }
 0x564   :  { %2484 = vmatprep.subr.bf16.mxu0 %v2838_v38  ;;  %2516 = vmatprep.subr.bf16.mxu1 %v2840_v41 }
 0x619   :  { %v1384_v20 = vpop.f32.mrb[10].mxu0  ;;  %v1455_v21 = vpop.f32.mrb[10].mxu1 }
 0x61a   :  { %v2581_v24 = vadd.f32 %v1384_v20, %v3015_v35  ;;  %v1386_v28 = vpop.f32.mrb[11].mxu0  ;;  %v1457_v42 = vpop.f32.mrb[11].mxu1  ;;  %v2597_v51 = vadd.f32 %v1455_v21, %v3020_v45  ;;  %v1822_v20 = vld [vmem:[%s3344_s4 + $0x20] sm:$0xff]  ;;  %v1823_v21 = vld [vmem:[%s3344_s4 + $0x28] sm:$0xff] }
 0x61b   :  { %v2582_v43 = vadd.f32 %v1386_v28, %v3017_v39  ;;  %v2598_v52 = vadd.f32 %v1457_v42, %v3024_v1  ;;  %v1824_v28 = vld [vmem:[%s3344_s4 + $0x30] sm:$0xff]  ;;  %v1825_v42 = vld [vmem:[%s3344_s4 + $0x38] sm:$0xff] }
 0x61c   :  { %v1464_v46 = vmul.f32 0.5, %v2581_v24  ;;  %v2554_v24 = vpack.c.bf16 %v1823_v21, %v1822_v20 }
 0x61d   :  { %v1468_v49 = vmul.f32 0.5, %v2582_v43  ;;  %v1473_v38 = vmul.f32 0.5, %v2598_v52  ;;  %v2557_v43 = vpack.c.bf16 %v1825_v42, %v1824_v28  ;;  %v1828_v52 = vld [vmem:[%s3344_s4 + $0x50] sm:$0xff] }
 0x61e   :  { %2692 = vtanh.f32 %v1464_v46  ;;  %v1826_v46 = vld [vmem:[%s3344_s4 + $0x40] sm:$0xff] }
 0x61f   :  { %2694 = vtanh.f32 %v1468_v49  ;;  %v1827_v49 = vld [vmem:[%s3344_s4 + $0x48] sm:$0xff] }
 0x620   :  { %2696 = vtanh.f32 %v2597_v51  ;;  %v2560_v51 = vpack.c.bf16 %v1827_v49, %v1826_v46 }
 0x621   :  { %2698 = vtanh.f32 %v1473_v38  ;;  %v1829_v38 = vld [vmem:[%s3344_s4 + $0x58] sm:$0xff] }
 0x628   :  { %v2693_v55 = vpop.eup %2692 }
 0x629   :  { %v2695_v41 = vpop.eup %2694  ;;  %v1466_v57 = vmul.f32 0.5, %v2693_v55  ;;  %v2563_v55 = vpack.c.bf16 %v1829_v38, %v1828_v52 }
 0x62a   :  { %v1470_v59 = vmul.f32 0.5, %v2695_v41  ;;  %v2697_v2 = vpop.eup %2696  ;;  %v1830_v41 = vld [vmem:[%s3344_s4 + $0x60] sm:$0xff] }
 0x62b   :  { %v1467_v61 = vadd.f32 0.5, %v1466_v57  ;;  %v2699_v12 = vpop.eup %2698  ;;  %v1831_v57 = vld [vmem:[%s3344_s4 + $0x68] sm:$0xff] }
 0x62c   :  { %v1471_v5 = vadd.f32 0.5, %v1470_v59  ;;  %v1475_v15 = vmul.f32 0.5, %v2699_v12  ;;  %v2566_v59 = vpack.c.bf16 %v1831_v57, %v1830_v41 }
 0x62d   :  { %v1478_v7 = vmul.f32 %v2697_v2, %v1467_v61  ;;  %v1832_v61 = vld [vmem:[%s3344_s4 + $0x70] sm:$0xff]  ;;  %v1833_v2 = vld [vmem:[%s3344_s4 + $0x78] sm:$0xff] }
 0x62e   :  { %v1477_v8 = vmul.f32 %v1471_v5, %v3195_v17  ;;  %v1476_v30 = vadd.f32 0.5, %v1475_v15  ;;  %v1820_v17 = vld [vmem:[%s3344_s4 + $0x10] sm:$0xff]  ;;  %v2569_v5 = vpack.c.bf16 %v1833_v2, %v1832_v61 }
 0x62f   :  { %v2551_v37 = vpack.c.bf16 %v1821_v34, %v1820_v17 }
 0x630   :  { %v3237_v11 = vadd.f32 %v1478_v7, %v1477_v8 }
 0x632   :  { %2700 = vtanh.f32 %v3237_v11 }
 0x63c   :  { %v2701_v31 = vpop.eup %2700 }
 0x63d   :  { %v1481_v33 = vmul.f32 %v2701_v31, %v1476_v30 }
 0x63f   :  { %1551 = vmatmul.mubr.f32.vlgmr.msra.gmra.mrb[12].mxu0 %v1481_v33  ;;  %1622 = vmatmul.mubr.f32.vlgmr.msra.gmra.mrb[12].mxu1 %v1481_v33 }
 0x640   :  { %2486 = vmatpush1.bf16.msra.mxu0 %v2845_v47  ;;  %2518 = vmatpush1.bf16.msra.mxu1 %v2848_v50 }
 0x641   :  { %2488 = vmatprep.subr.bf16.mxu0 %v2851_v53  ;;  %2520 = vmatprep.subr.bf16.mxu1 %v2853_v56 }
 0x642   :  { %1718 = vmatprep.mubr.f32.mxu0 %v2774_v0  ;;  %1789 = vmatprep.mubr.f32.mxu1 %v2774_v0 }
 0x644   :  { %2490 = vmatpush1.bf16.msra.mxu0 %v2859_v60  ;;  %2522 = vmatpush1.bf16.msra.mxu1 %v2863_v63 }
 0x645   :  { %2492 = vmatprep.subr.bf16.mxu0 %v2867_v3  ;;  %2524 = vmatprep.subr.bf16.mxu1 %v2870_v6 }
 0x648   :  { %2494 = vmatpush1.bf16.msra.mxu0 %v2876_v10  ;;  %2526 = vmatpush1.bf16.msra.mxu1 %v2880_v13 }
 0x649   :  { %2496 = vmatprep.subr.bf16.mxu0 %v2884_v16  ;;  %2528 = vmatprep.subr.bf16.mxu1 %v2887_v19 }
 0x64c   :  { %2498 = vmatpush1.bf16.msra.mxu0 %v2893_v23  ;;  %2530 = vmatpush1.bf16.msra.mxu1 %v2897_v26 }
 0x64d   :  { %2500 = vmatprep.subr.bf16.mxu0 %v2901_v29  ;;  %2532 = vmatprep.subr.bf16.mxu1 %v2904_v32 }
 0x650   :  { %2502 = vmatpush1.bf16.msra.mxu0 %v2910_v36  ;;  %2534 = vmatpush1.bf16.msra.mxu1 %v2914_v40 }
 0x651   :  { %2504 = vmatprep.subr.bf16.mxu0 %v2918_v44  ;;  %2536 = vmatprep.subr.bf16.mxu1 %v2921_v48 }
 0x654   :  { %2506 = vmatpush1.bf16.msra.mxu0 %v2927_v54  ;;  %2538 = vmatpush1.bf16.msra.mxu1 %v2931_v58 }
 0x655   :  { %2508 = vmatprep.subr.bf16.mxu0 %v2935_v62  ;;  %2540 = vmatprep.subr.bf16.mxu1 %v2938_v4 }
 0x658   :  { %2510 = vmatpush1.bf16.msra.mxu0 %v2944_v9  ;;  %2542 = vmatpush1.bf16.msra.mxu1 %v2948_v14 }
 0x659   :  { %2512 = vmatprep.subr.bf16.mxu0 %v2952_v18  ;;  %2544 = vmatprep.subr.bf16.mxu1 %v2955_v22  ;;  %v1818_v18 = vld [vmem:[%s3344_s4] sm:$0xff]  ;;  %v1819_v22 = vld [vmem:[%s3344_s4 + $0x8] sm:$0xff] }
 0x65c   :  { %2514 = vmatpush1.bf16.msra.mxu0 %v2961_v25  ;;  %2546 = vmatpush1.bf16.msra.mxu1 %v2965_v27  ;;  %v2548_v25 = vpack.c.bf16 %v1819_v22, %v1818_v18  ;;  %v2775_v27 = vmov 0.0|0.0  }
 0x65d   :  { %2547 = vmatprep.subr.bf16.mxu0 %v2775_v27 }
 0x712   :  { %v1552_v47 = vpop.f32.mrb[12].mxu0  ;;  %v1623_v50 = vpop.f32.mrb[12].mxu1 }
 0x713   :  { %v2583_v53 = vadd.f32 %v1552_v47, %v3015_v35  ;;  %v1554_v56 = vpop.f32.mrb[13].mxu0  ;;  %v1625_v60 = vpop.f32.mrb[13].mxu1  ;;  %v2599_v10 = vadd.f32 %v1623_v50, %v3020_v45 }
 0x714   :  { %v2584_v63 = vadd.f32 %v1554_v56, %v3017_v39  ;;  %v2600_v13 = vadd.f32 %v1625_v60, %v3024_v1 }
 0x715   :  { %v1632_v3 = vmul.f32 0.5, %v2583_v53 }
 0x716   :  { %v1636_v6 = vmul.f32 0.5, %v2584_v63  ;;  %v1641_v16 = vmul.f32 0.5, %v2600_v13 }
 0x717   :  { %2702 = vtanh.f32 %v1632_v3 }
 0x718   :  { %2704 = vtanh.f32 %v1636_v6 }
 0x719   :  { %2706 = vtanh.f32 %v2599_v10 }
 0x71a   :  { %2708 = vtanh.f32 %v1641_v16 }
 0x721   :  { %v2703_v19 = vpop.eup %2702 }
 0x722   :  { %v2705_v23 = vpop.eup %2704  ;;  %v1634_v26 = vmul.f32 0.5, %v2703_v19 }
 0x723   :  { %v1638_v29 = vmul.f32 0.5, %v2705_v23  ;;  %v2707_v36 = vpop.eup %2706 }
 0x724   :  { %v1635_v32 = vadd.f32 0.5, %v1634_v26  ;;  %v2709_v58 = vpop.eup %2708 }
 0x725   :  { %v1639_v40 = vadd.f32 0.5, %v1638_v29  ;;  %v1643_v62 = vmul.f32 0.5, %v2709_v58 }
 0x726   :  { %v1646_v44 = vmul.f32 %v2707_v36, %v1635_v32 }
 0x727   :  { %v1645_v48 = vmul.f32 %v1639_v40, %v3237_v11  ;;  %v1644_v4 = vadd.f32 0.5, %v1643_v62 }
 0x729   :  { %v3277_v54 = vadd.f32 %v1646_v44, %v1645_v48 }
 0x72b   :  { %2710 = vtanh.f32 %v3277_v54 }
 0x735   :  { %v2711_v9 = vpop.eup %2710 }
 0x736   :  { %v1649_v14 = vmul.f32 %v2711_v9, %v1644_v4 }
 0x738   :  { %1719 = vmatmul.mubr.f32.vlgmr.msra.gmra.mrb[14].mxu0 %v1649_v14  ;;  %1790 = vmatmul.mubr.f32.vlgmr.msra.gmra.mrb[14].mxu1 %v1649_v14 }
 0x739   :  { %2549 = vmatpush3.bf16.msra.mxu0 %v2548_v25  ;;  %1968 = vmatprep.mubr.msk.f32.mxu0 %vm2776_vm0, %v2774_v0 }
 0x73a   :  { %2550 = vmatprep.subr.bf16.mxu0 %v2775_v27 }
 0x73d   :  { %2552 = vmatpush3.bf16.msra.mxu0 %v2551_v37 }
 0x73e   :  { %2553 = vmatprep.subr.bf16.mxu0 %v2775_v27 }
 0x741   :  { %2555 = vmatpush3.bf16.msra.mxu0 %v2554_v24 }
 0x742   :  { %2556 = vmatprep.subr.bf16.mxu0 %v2775_v27 }
 0x745   :  { %2558 = vmatpush3.bf16.msra.mxu0 %v2557_v43 }
 0x746   :  { %2559 = vmatprep.subr.bf16.mxu0 %v2775_v27 }
 0x749   :  { %2561 = vmatpush3.bf16.msra.mxu0 %v2560_v51 }
 0x74a   :  { %2562 = vmatprep.subr.bf16.mxu0 %v2775_v27 }
 0x74d   :  { %2564 = vmatpush3.bf16.msra.mxu0 %v2563_v55 }
 0x74e   :  { %2565 = vmatprep.subr.bf16.mxu0 %v2775_v27 }
 0x751   :  { %2567 = vmatpush3.bf16.msra.mxu0 %v2566_v59 }
 0x752   :  { %2568 = vmatprep.subr.bf16.mxu0 %v2775_v27 }
 0x755   :  { %2570 = vmatpush3.bf16.msra.mxu0 %v2569_v5 }
 0x80b   :  { %v1720_v7 = vpop.f32.mrb[14].mxu0  ;;  %v1791_v8 = vpop.f32.mrb[14].mxu1 }
 0x80c   :  { %v2585_v11 = vadd.f32 %v1720_v7, %v3015_v35  ;;  %v1722_v12 = vpop.f32.mrb[15].mxu0  ;;  %v1793_v15 = vpop.f32.mrb[15].mxu1  ;;  %v2601_v47 = vadd.f32 %v1791_v8, %v3020_v45 }
 0x80d   :  { %v2586_v30 = vadd.f32 %v1722_v12, %v3017_v39  ;;  %v2602_v50 = vadd.f32 %v1793_v15, %v3024_v1  ;;  %v1918_v1 = vld [vmem:[%s3345_s5] ss:$0 sm:$0xff] }
 0x80e   :  { %v1800_v31 = vmul.f32 0.5, %v2585_v11 }
 0x80f   :  { %v1804_v33 = vmul.f32 0.5, %v2586_v30  ;;  %v1809_v53 = vmul.f32 0.5, %v2602_v50 }
 0x810   :  { %2712 = vtanh.f32 %v1800_v31 }
 0x811   :  { %2714 = vtanh.f32 %v1804_v33 }
 0x812   :  { %2716 = vtanh.f32 %v2601_v47 }
 0x813   :  { %2718 = vtanh.f32 %v1809_v53 }
 0x81a   :  { %v2713_v56 = vpop.eup %2712 }
 0x81b   :  { %v2715_v0 = vpop.eup %2714  ;;  %v1802_v60 = vmul.f32 0.5, %v2713_v56 }
 0x81c   :  { %v1806_v63 = vmul.f32 0.5, %v2715_v0  ;;  %v2717_v3 = vpop.eup %2716 }
 0x81d   :  { %v1803_v35 = vadd.f32 0.5, %v1802_v60  ;;  %v2719_v16 = vpop.eup %2718 }
 0x81e   :  { %v1807_v6 = vadd.f32 0.5, %v1806_v63  ;;  %v1811_v45 = vmul.f32 0.5, %v2719_v16 }
 0x81f   :  { %v1814_v10 = vmul.f32 %v2717_v3, %v1803_v35 }
 0x820   :  { %v1813_v39 = vmul.f32 %v1807_v6, %v3277_v54  ;;  %v1812_v19 = vadd.f32 0.5, %v1811_v45 }
 0x822   :  { %v1815_v13 = vadd.f32 %v1814_v10, %v1813_v39 }
 0x824   :  { %2720 = vtanh.f32 %v1815_v13 }
 0x82e   :  { %v2721_v23 = vpop.eup %2720 }
 0x82f   :  { %v1817_v26 = vmul.f32 %v2721_v23, %v1812_v19 }
 0x831   :  { %1969 = vmatmul.mubr.f32.vlgmr.msra.gmra.mrb[16].mxu0 %v1817_v26 }
 0x904   :  { %v1907_v29 = vpop.f32.mrb[16].mxu0 }
 0x905   :  { %v1908_v32 = vadd.f32 %v1918_v1, %v1907_v29  ;;  %v1970_v36 = vpop.f32.mrb[17].mxu0 }
 0x907   :  { %1911 = vst [vmem:[%s3346_s6] sm:$0xff] %v1908_v32 }
 0x908   :  { %1916 = vsyncpa [#allocation4], 1 }
 0x909   :  { %1917 = vsyncpa [#allocation6], 1 }

</bundles_post_ra>
